<compile_context>
chip_gen: v7x
topology: tpu7x:2x2x1
jax: 0.10.0
libtpu: 0.0.40
codegen_flags: <defaults>
</compile_context>

<pallas_src>
import math

import jax
import jax.numpy as jnp
from jax import lax
from jax.experimental import pallas as pl
from jax.experimental.pallas import tpu as pltpu

B = 2            # batch
T = 20           # num_frames (forced by reshape(batch, 20, 1) in forward)
F_IN = 10        # num_inputs
D = F_IN + 1     # 11 = num_inputs + 1 (pos-enc concat) == num_outputs
H = 32           # LSTM hidden size
G4 = 4 * H       # 128: fused LSTM gate width == one vreg lane width
NB = T * B       # 40 rows (batch-major: row = b*T + t)
EPS = 1e-5       # nn.LayerNorm default

# ---- packed parameter slab layout (rows x 128 lanes, 8-row aligned blocks) --
_R_WIDEN = 0     # (10, 11)  [I_10 | 0] lane-widening matrix
_R_WQ = 16       # (11, 11)  fused (query Linear) o (MHA in_proj q), 1/sqrt(11)
_R_WK = 32       # (11, 11)
_R_WV = 48       # (11, 11)
_R_WOUT = 64     # (11, 11)  MHA out_proj weight
_R_WPOST = 80    # (11, 11)  post_linear weight
_R_WIH = 96      # (11, 128) fused LSTM W_ih, gates [f|i|o|g]
_R_WHH = 112     # (32, 128) fused LSTM W_hh, gates [f|i|o|g]
_R_BQ = 144      # (1, 11)
_R_BK = 145      # (1, 11)
_R_BV = 146      # (1, 11)
_R_BOUT = 147    # (1, 11)
_R_BPOST = 148   # (1, 11)
_R_G1 = 149      # (1, 11) norm_1 gamma
_R_B1 = 150      # (1, 11) norm_1 beta
_R_G2 = 151      # (1, 11) norm_2 gamma
_R_B2 = 152      # (1, 11) norm_2 beta
_R_LSTMB = 153   # (1, 128) b_ih + b_hh, gates [f|i|o|g]
_R_POSADD = 160  # (40, 11) additive pos-enc column (col 10 = (row%T)*T)
_R_MASK = 200    # (40, 40) additive block-diagonal batch mask (0 / -1e30)
_R_PERM = 240    # (40, 40) batch-major -> time-major permutation
_SLAB_ROWS = 280


def _layernorm2d(x, gamma, beta):
    # x: (N, D); gamma/beta: (1, D)
    mu = jnp.mean(x, axis=-1, keepdims=True)
    var = jnp.mean((x - mu) ** 2, axis=-1, keepdims=True)
    return (x - mu) * lax.rsqrt(var + EPS) * gamma + beta


def attention_base_kernel(x_ref, slab_ref, o_ref):
    # x_ref: (40, 10) batch-major rows (row = b*T + t), raw state features
    # slab_ref: (_SLAB_ROWS, 128) packed fused parameters
    x10 = x_ref[...]                                                 # (40, 10)

    # ---- pos-enc + widen 10 -> 11 lanes: baked [I|0] matmul + baked column --
    widen = slab_ref[_R_WIDEN:_R_WIDEN + F_IN, 0:D]                  # (10, 11)
    pos_add = slab_ref[_R_POSADD:_R_POSADD + NB, 0:D]                # (40, 11)
    x = jnp.dot(x10, widen, preferred_element_type=jnp.float32) + pos_add

    # ---- fused Q/K/V: three row-disjoint (11,11) matmuls, no lane slicing ---
    wq = slab_ref[_R_WQ:_R_WQ + D, 0:D]
    wk = slab_ref[_R_WK:_R_WK + D, 0:D]
    wv = slab_ref[_R_WV:_R_WV + D, 0:D]
    bq = slab_ref[_R_BQ:_R_BQ + 1, 0:D]
    bk = slab_ref[_R_BK:_R_BK + 1, 0:D]
    bv = slab_ref[_R_BV:_R_BV + 1, 0:D]
    q = jnp.dot(x, wq, preferred_element_type=jnp.float32) + bq  # 1/sqrt(D) folded
    k = jnp.dot(x, wk, preferred_element_type=jnp.float32) + bk
    v = jnp.dot(x, wv, preferred_element_type=jnp.float32) + bv

    # ---- single-head attention, baked additive block-diagonal batch mask ----
    scores = jnp.einsum('nd,md->nm', q, k,
                        preferred_element_type=jnp.float32)          # (40, 40)
    scores = scores + slab_ref[_R_MASK:_R_MASK + NB, 0:NB]
    scores = scores - jnp.max(scores, axis=-1, keepdims=True)
    p = jnp.exp(scores)
    attn = p / jnp.sum(p, axis=-1, keepdims=True)                    # exact div
    ctx = jnp.dot(attn, v, preferred_element_type=jnp.float32)       # (40, 11)

    # ---- MHA out_proj -------------------------------------------------------
    w_out = slab_ref[_R_WOUT:_R_WOUT + D, 0:D]
    b_out = slab_ref[_R_BOUT:_R_BOUT + 1, 0:D]
    ctx = jnp.dot(ctx, w_out, preferred_element_type=jnp.float32) + b_out

    # ---- residual + norm_1 + post_linear + residual + norm_2 ----------------
    g1 = slab_ref[_R_G1:_R_G1 + 1, 0:D]
    b1 = slab_ref[_R_B1:_R_B1 + 1, 0:D]
    g2 = slab_ref[_R_G2:_R_G2 + 1, 0:D]
    b2 = slab_ref[_R_B2:_R_B2 + 1, 0:D]
    w_post = slab_ref[_R_WPOST:_R_WPOST + D, 0:D]
    b_post = slab_ref[_R_BPOST:_R_BPOST + 1, 0:D]

    context = _layernorm2d(ctx + x, g1, b1)                          # (40, 11)
    lin_ctx = jnp.dot(context, w_post,
                      preferred_element_type=jnp.float32) + b_post
    lstm_in = _layernorm2d(context + lin_ctx, g2, b2)                # (40, 11)

    # ---- batch-major -> time-major via baked permutation matmul (MXU) -------
    perm = slab_ref[_R_PERM:_R_PERM + NB, 0:NB]                      # (40, 40)
    lstm_in_tm = jnp.dot(perm, lstm_in, preferred_element_type=jnp.float32)

    # ---- LSTM(11 -> 32): all input projections + biases in one matmul -------
    w_ih = slab_ref[_R_WIH:_R_WIH + D, :]                            # (11, 128)
    w_hh = slab_ref[_R_WHH:_R_WHH + H, :]                            # (32, 128)
    lb = slab_ref[_R_LSTMB:_R_LSTMB + 1, :]                          # (1, 128)
    xproj = jnp.dot(lstm_in_tm, w_ih,
                    preferred_element_type=jnp.float32) + lb         # (40, 128)

    # Fused single-EUP activations, hoisted constants:
    #   sigmoid(x) = 0.5*tanh(0.5*x) + 0.5 on lanes 0:96 ([f|i|o]),
    #   tanh(x) on lanes 96:128 ([g])  -> ONE tanh over 128 lanes per step.
    lane = lax.broadcasted_iota(jnp.int32, (B, G4), 1)
    sc = jnp.where(lane < 3 * H, 0.5, 1.0)
    off = jnp.where(lane < 3 * H, 0.5, 0.0)

    def gates_of(pre):
        return jnp.tanh(pre * sc) * sc + off

    # step t=0: h = c = 0 -> skip the h @ W_hh matmul and the f*c term
    g0 = gates_of(xproj[0:B, :])
    c = g0[:, H:2 * H] * g0[:, 3 * H:4 * H]                          # i * g
    h = g0[:, 2 * H:3 * H] * jnp.tanh(c)                             # o * tanh(c)

    # TODO(synk): if the Mosaic bundle dump shows W_hh re-pushed each step,
    # switch to explicit weight-stationary MXU driving (pltpu.matmul_push_rhs
    # once + matmul_acc_lhs/matmul_pop per step; seed the MRB with xproj_t on
    # v7x to also absorb the per-step add).
    for t in range(1, T):
        pre = xproj[t * B:(t + 1) * B, :] + jnp.dot(
            h, w_hh, preferred_element_type=jnp.float32)             # (B, 128)
        g = gates_of(pre)
        c = g[:, 0:H] * c + g[:, H:2 * H] * g[:, 3 * H:4 * H]        # f*c + i*g
        h = g[:, 2 * H:3 * H] * jnp.tanh(c)                          # o*tanh(c)

    # embedded.squeeze(0) -> (B, 32)
    o_ref[...] = h.astype(o_ref.dtype)


def fuse_and_pack_params(p):
    """Algebraic weight fusion + packing into one (280, 128) f32 slab.

    - Wq' = Wq @ W_inq with 1/sqrt(11) folded in; same (unscaled) for K, V.
    - LSTM gates reordered PyTorch [i|f|g|o] -> [f|i|o|g] (f lane-aligned with
      c); b_ih + b_hh fused into one row.
    - Baked constants: [I|0] widening matrix, additive pos-enc column,
      additive block-diagonal batch mask, batch->time-major permutation.
    """
    s = 1.0 / math.sqrt(D)
    wq_f = (p['wq'] @ p['w_inq']) * s
    bq_f = p['b_inq'] * s
    wk_f = p['wk'] @ p['w_ink']
    bk_f = p['b_ink']
    wv_f = p['wv'] @ p['w_inv']
    bv_f = p['b_inv']

    def reorder(w):  # gate columns [i|f|g|o] -> [f|i|o|g]
        i, f, g, o = jnp.split(w, 4, axis=-1)
        return jnp.concatenate([f, i, o, g], axis=-1)

    w_ih = reorder(p['w_ih'])                                        # (11, 128)
    w_hh = reorder(p['w_hh'])                                        # (32, 128)
    lstm_b = reorder(p['b_ih'] + p['b_hh'])                          # (128,)

    widen = jnp.concatenate(
        [jnp.eye(F_IN, dtype=jnp.float32), jnp.zeros((F_IN, 1), jnp.float32)],
        axis=1)                                                      # (10, 11)
    pos_col = (jnp.arange(NB) % T).astype(jnp.float32) * float(T)    # (40,)
    pos_add = jnp.zeros((NB, D), jnp.float32).at[:, F_IN].set(pos_col)
    rb = jnp.arange(NB) // T
    mask = jnp.where(rb[:, None] == rb[None, :], 0.0, -1e30).astype(jnp.float32)
    i_idx = jnp.arange(NB)                                           # tm row 2t+b
    src = (i_idx % B) * T + (i_idx // B)                             # bm row b*T+t
    perm = jnp.zeros((NB, NB), jnp.float32).at[i_idx, src].set(1.0)

    slab = jnp.zeros((_SLAB_ROWS, G4), jnp.float32)
    slab = slab.at[_R_WIDEN:_R_WIDEN + F_IN, 0:D].set(widen)
    slab = slab.at[_R_WQ:_R_WQ + D, 0:D].set(wq_f)
    slab = slab.at[_R_WK:_R_WK + D, 0:D].set(wk_f)
    slab = slab.at[_R_WV:_R_WV + D, 0:D].set(wv_f)
    slab = slab.at[_R_WOUT:_R_WOUT + D, 0:D].set(p['w_mha_out'])
    slab = slab.at[_R_WPOST:_R_WPOST + D, 0:D].set(p['w_post'])
    slab = slab.at[_R_WIH:_R_WIH + D, :].set(w_ih)
    slab = slab.at[_R_WHH:_R_WHH + H, :].set(w_hh)
    slab = slab.at[_R_BQ, 0:D].set(bq_f)
    slab = slab.at[_R_BK, 0:D].set(bk_f)
    slab = slab.at[_R_BV, 0:D].set(bv_f)
    slab = slab.at[_R_BOUT, 0:D].set(p['b_mha_out'])
    slab = slab.at[_R_BPOST, 0:D].set(p['b_post'])
    slab = slab.at[_R_G1, 0:D].set(p['ln1_g'])
    slab = slab.at[_R_B1, 0:D].set(p['ln1_b'])
    slab = slab.at[_R_G2, 0:D].set(p['ln2_g'])
    slab = slab.at[_R_B2, 0:D].set(p['ln2_b'])
    slab = slab.at[_R_LSTMB, :].set(lstm_b)
    slab = slab.at[_R_POSADD:_R_POSADD + NB, 0:D].set(pos_add)
    slab = slab.at[_R_MASK:_R_MASK + NB, 0:NB].set(mask)
    slab = slab.at[_R_PERM:_R_PERM + NB, 0:NB].set(perm)
    return slab


@jax.jit
def attention_base_forward(state, slab):
    """state: (B, T, F_IN) float32; slab: packed fused parameters."""
    b, t, f = state.shape
    # Free bitcast reshape (no transpose / concat / iota in the wrapper):
    # batch-major rows (row = b*T + t); pos-enc, widening and time-major
    # rearrangement all happen inside the kernel.
    x2d = state.reshape(b * t, f)

    vmem = pl.BlockSpec(memory_space=pltpu.MemorySpace.VMEM)
    return pl.pallas_call(
        attention_base_kernel,
        out_shape=jax.ShapeDtypeStruct((b, H), jnp.float32),
        in_specs=[vmem, vmem],
        out_specs=vmem,
        cost_estimate=pl.CostEstimate(
            flops=600_000, transcendentals=10_000, bytes_accessed=120_000),
    )(x2d, slab)


def init_params(key):
    """Deterministic synthetic parameters of the original module, stored
    pre-transposed as (in, out); LayerNorms use the PyTorch default init."""
    keys = jax.random.split(key, 20)
    k = iter(keys)

    def w(shape, scale=0.1):
        return (scale * jax.random.normal(next(k), shape)).astype(jnp.float32)

    return {
        # query / key / value : Linear(11 -> 11, bias=False)
        'wq': w((D, D)), 'wk': w((D, D)), 'wv': w((D, D)),
        # MHA in_proj split per q/k/v (+ biases)
        'w_inq': w((D, D)), 'w_ink': w((D, D)), 'w_inv': w((D, D)),
        'b_inq': w((D,)), 'b_ink': w((D,)), 'b_inv': w((D,)),
        # MHA out_proj
        'w_mha_out': w((D, D)), 'b_mha_out': w((D,)),
        # post_linear
        'w_post': w((D, D)), 'b_post': w((D,)),
        # norm_1 / norm_2
        'ln1_g': jnp.ones((D,), jnp.float32),
        'ln1_b': jnp.zeros((D,), jnp.float32),
        'ln2_g': jnp.ones((D,), jnp.float32),
        'ln2_b': jnp.zeros((D,), jnp.float32),
        # LSTM (gate order i, f, g, o as in PyTorch), stored (in, out)
        'w_ih': w((D, 4 * H)), 'w_hh': w((H, 4 * H)),
        'b_ih': w((4 * H,)), 'b_hh': w((4 * H,)),
    }


if __name__ == "__main__":
    key = jax.random.PRNGKey(0)
    k_state, k_params = jax.random.split(key)

    state = jax.random.normal(k_state, (B, T, F_IN), dtype=jnp.float32)
    params = init_params(k_params)
    slab = fuse_and_pack_params(params)

    out = attention_base_forward(state, slab)
    jax.block_until_ready(out)
    assert out.shape == (B, H) and out.dtype == jnp.float32
    assert bool(jnp.all(jnp.isfinite(out)))
    print("KERNEL_OK")
</pallas_src>

<mosaic_0001>
module attributes {stable_mosaic.version = 11 : i64} {
  func.func @attention_base_kernel(%arg0: memref<40x10xf32, #tpu.memory_space<vmem>>, %arg1: memref<280x128xf32, #tpu.memory_space<vmem>>, %arg2: memref<2x32xf32, #tpu.memory_space<vmem>>) attributes {dimension_semantics = [], scalar_prefetch = 0 : i64, scratch_operands = 0 : i64, tpu.core_type = #tpu.core_type<tc>} {
    %c0 = arith.constant 0 : index
    %c0_0 = arith.constant 0 : index
    %0 = vector.load %arg0[%c0, %c0_0] : memref<40x10xf32, #tpu.memory_space<vmem>>, vector<40x10xf32>
    %c0_1 = arith.constant 0 : index
    %c0_2 = arith.constant 0 : index
    %1 = vector.load %arg1[%c0_1, %c0_2] : memref<280x128xf32, #tpu.memory_space<vmem>>, vector<10x11xf32>
    %c160 = arith.constant 160 : index
    %c0_3 = arith.constant 0 : index
    %2 = vector.load %arg1[%c160, %c0_3] : memref<280x128xf32, #tpu.memory_space<vmem>>, vector<40x11xf32>
    %cst = arith.constant dense<0.000000e+00> : vector<40x11xf32>
    %3 = tpu.matmul %0, %1, %cst {dimension_numbers = #tpu.dot_dimension_numbers<[1], [0], [0], [1], [0, 0, 1, 1], [], []>} : vector<40x10xf32>, vector<10x11xf32>, vector<40x11xf32> -> vector<40x11xf32>
    %4 = arith.addf %3, %2 : vector<40x11xf32>
    %c16 = arith.constant 16 : index
    %c0_4 = arith.constant 0 : index
    %5 = vector.load %arg1[%c16, %c0_4] : memref<280x128xf32, #tpu.memory_space<vmem>>, vector<11x11xf32>
    %c32 = arith.constant 32 : index
    %c0_5 = arith.constant 0 : index
    %6 = vector.load %arg1[%c32, %c0_5] : memref<280x128xf32, #tpu.memory_space<vmem>>, vector<11x11xf32>
    %c48 = arith.constant 48 : index
    %c0_6 = arith.constant 0 : index
    %7 = vector.load %arg1[%c48, %c0_6] : memref<280x128xf32, #tpu.memory_space<vmem>>, vector<11x11xf32>
    %c144 = arith.constant 144 : index
    %c0_7 = arith.constant 0 : index
    %8 = vector.load %arg1[%c144, %c0_7] : memref<280x128xf32, #tpu.memory_space<vmem>>, vector<1x11xf32>
    %c145 = arith.constant 145 : index
    %c0_8 = arith.constant 0 : index
    %9 = vector.load %arg1[%c145, %c0_8] : memref<280x128xf32, #tpu.memory_space<vmem>>, vector<1x11xf32>
    %c146 = arith.constant 146 : index
    %c0_9 = arith.constant 0 : index
    %10 = vector.load %arg1[%c146, %c0_9] : memref<280x128xf32, #tpu.memory_space<vmem>>, vector<1x11xf32>
    %cst_10 = arith.constant dense<0.000000e+00> : vector<40x11xf32>
    %11 = tpu.matmul %4, %5, %cst_10 {dimension_numbers = #tpu.dot_dimension_numbers<[1], [0], [0], [1], [0, 0, 1, 1], [], []>} : vector<40x11xf32>, vector<11x11xf32>, vector<40x11xf32> -> vector<40x11xf32>
    %12 = vector.broadcast %8 : vector<1x11xf32> to vector<40x11xf32>
    %13 = arith.addf %11, %12 : vector<40x11xf32>
    %cst_11 = arith.constant dense<0.000000e+00> : vector<40x11xf32>
    %14 = tpu.matmul %4, %6, %cst_11 {dimension_numbers = #tpu.dot_dimension_numbers<[1], [0], [0], [1], [0, 0, 1, 1], [], []>} : vector<40x11xf32>, vector<11x11xf32>, vector<40x11xf32> -> vector<40x11xf32>
    %15 = vector.broadcast %9 : vector<1x11xf32> to vector<40x11xf32>
    %16 = arith.addf %14, %15 : vector<40x11xf32>
    %cst_12 = arith.constant dense<0.000000e+00> : vector<40x11xf32>
    %17 = tpu.matmul %4, %7, %cst_12 {dimension_numbers = #tpu.dot_dimension_numbers<[1], [0], [0], [1], [0, 0, 1, 1], [], []>} : vector<40x11xf32>, vector<11x11xf32>, vector<40x11xf32> -> vector<40x11xf32>
    %18 = vector.broadcast %10 : vector<1x11xf32> to vector<40x11xf32>
    %19 = arith.addf %17, %18 : vector<40x11xf32>
    "tpu.trace_start"() <{level = 10 : i32, message = "nd,md->nm"}> : () -> ()
    %cst_13 = arith.constant dense<0.000000e+00> : vector<40x40xf32>
    %20 = tpu.matmul %13, %16, %cst_13 {dimension_numbers = #tpu.dot_dimension_numbers<[1], [1], [0], [0], [0, 0, 1, 0], [], []>} : vector<40x11xf32>, vector<40x11xf32>, vector<40x40xf32> -> vector<40x40xf32>
    "tpu.trace_stop"() : () -> ()
    %c200 = arith.constant 200 : index
    %c0_14 = arith.constant 0 : index
    %21 = vector.load %arg1[%c200, %c0_14] : memref<280x128xf32, #tpu.memory_space<vmem>>, vector<40x40xf32>
    %22 = arith.addf %20, %21 : vector<40x40xf32>
    %cst_15 = arith.constant dense<0xFF800000> : vector<40xf32>
    %23 = vector.multi_reduction <maximumf>, %22, %cst_15 [1] : vector<40x40xf32> to vector<40xf32>
    %24 = vector.shape_cast %23 : vector<40xf32> to vector<40x1xf32>
    %25 = vector.broadcast %24 : vector<40x1xf32> to vector<40x40xf32>
    %26 = arith.subf %22, %25 : vector<40x40xf32>
    %27 = math.exp %26 : vector<40x40xf32>
    %cst_16 = arith.constant dense<0.000000e+00> : vector<40xf32>
    %28 = vector.multi_reduction <add>, %27, %cst_16 [1] : vector<40x40xf32> to vector<40xf32>
    %29 = vector.shape_cast %28 : vector<40xf32> to vector<40x1xf32>
    %30 = vector.broadcast %29 : vector<40x1xf32> to vector<40x40xf32>
    %31 = arith.divf %27, %30 : vector<40x40xf32>
    %cst_17 = arith.constant dense<0.000000e+00> : vector<40x11xf32>
    %32 = tpu.matmul %31, %19, %cst_17 {dimension_numbers = #tpu.dot_dimension_numbers<[1], [0], [0], [1], [0, 0, 1, 1], [], []>} : vector<40x40xf32>, vector<40x11xf32>, vector<40x11xf32> -> vector<40x11xf32>
    %c64 = arith.constant 64 : index
    %c0_18 = arith.constant 0 : index
    %33 = vector.load %arg1[%c64, %c0_18] : memref<280x128xf32, #tpu.memory_space<vmem>>, vector<11x11xf32>
    %c147 = arith.constant 147 : index
    %c0_19 = arith.constant 0 : index
    %34 = vector.load %arg1[%c147, %c0_19] : memref<280x128xf32, #tpu.memory_space<vmem>>, vector<1x11xf32>
    %cst_20 = arith.constant dense<0.000000e+00> : vector<40x11xf32>
    %35 = tpu.matmul %32, %33, %cst_20 {dimension_numbers = #tpu.dot_dimension_numbers<[1], [0], [0], [1], [0, 0, 1, 1], [], []>} : vector<40x11xf32>, vector<11x11xf32>, vector<40x11xf32> -> vector<40x11xf32>
    %36 = vector.broadcast %34 : vector<1x11xf32> to vector<40x11xf32>
    %37 = arith.addf %35, %36 : vector<40x11xf32>
    %c149 = arith.constant 149 : index
    %c0_21 = arith.constant 0 : index
    %38 = vector.load %arg1[%c149, %c0_21] : memref<280x128xf32, #tpu.memory_space<vmem>>, vector<1x11xf32>
    %c150 = arith.constant 150 : index
    %c0_22 = arith.constant 0 : index
    %39 = vector.load %arg1[%c150, %c0_22] : memref<280x128xf32, #tpu.memory_space<vmem>>, vector<1x11xf32>
    %c151 = arith.constant 151 : index
    %c0_23 = arith.constant 0 : index
    %40 = vector.load %arg1[%c151, %c0_23] : memref<280x128xf32, #tpu.memory_space<vmem>>, vector<1x11xf32>
    %c152 = arith.constant 152 : index
    %c0_24 = arith.constant 0 : index
    %41 = vector.load %arg1[%c152, %c0_24] : memref<280x128xf32, #tpu.memory_space<vmem>>, vector<1x11xf32>
    %c80 = arith.constant 80 : index
    %c0_25 = arith.constant 0 : index
    %42 = vector.load %arg1[%c80, %c0_25] : memref<280x128xf32, #tpu.memory_space<vmem>>, vector<11x11xf32>
    %c148 = arith.constant 148 : index
    %c0_26 = arith.constant 0 : index
    %43 = vector.load %arg1[%c148, %c0_26] : memref<280x128xf32, #tpu.memory_space<vmem>>, vector<1x11xf32>
    %44 = arith.addf %37, %4 : vector<40x11xf32>
    %cst_27 = arith.constant dense<0.000000e+00> : vector<40xf32>
    %45 = vector.multi_reduction <add>, %44, %cst_27 [1] : vector<40x11xf32> to vector<40xf32>
    %46 = vector.shape_cast %45 : vector<40xf32> to vector<40x1xf32>
    %cst_28 = arith.constant 1.100000e+01 : f32
    %47 = vector.broadcast %cst_28 : f32 to vector<40x1xf32>
    %48 = arith.divf %46, %47 : vector<40x1xf32>
    %49 = vector.broadcast %48 : vector<40x1xf32> to vector<40x11xf32>
    %50 = arith.subf %44, %49 : vector<40x11xf32>
    %51 = arith.mulf %50, %50 : vector<40x11xf32>
    %cst_29 = arith.constant dense<0.000000e+00> : vector<40xf32>
    %52 = vector.multi_reduction <add>, %51, %cst_29 [1] : vector<40x11xf32> to vector<40xf32>
    %53 = vector.shape_cast %52 : vector<40xf32> to vector<40x1xf32>
    %cst_30 = arith.constant 1.100000e+01 : f32
    %54 = vector.broadcast %cst_30 : f32 to vector<40x1xf32>
    %55 = arith.divf %53, %54 : vector<40x1xf32>
    %56 = vector.broadcast %48 : vector<40x1xf32> to vector<40x11xf32>
    %57 = arith.subf %44, %56 : vector<40x11xf32>
    %cst_31 = arith.constant 9.99999974E-6 : f32
    %58 = vector.broadcast %cst_31 : f32 to vector<40x1xf32>
    %59 = arith.addf %55, %58 : vector<40x1xf32>
    %60 = math.rsqrt %59 : vector<40x1xf32>
    %61 = vector.broadcast %60 : vector<40x1xf32> to vector<40x11xf32>
    %62 = arith.mulf %57, %61 : vector<40x11xf32>
    %63 = vector.broadcast %38 : vector<1x11xf32> to vector<40x11xf32>
    %64 = arith.mulf %62, %63 : vector<40x11xf32>
    %65 = vector.broadcast %39 : vector<1x11xf32> to vector<40x11xf32>
    %66 = arith.addf %64, %65 : vector<40x11xf32>
    %cst_32 = arith.constant dense<0.000000e+00> : vector<40x11xf32>
    %67 = tpu.matmul %66, %42, %cst_32 {dimension_numbers = #tpu.dot_dimension_numbers<[1], [0], [0], [1], [0, 0, 1, 1], [], []>} : vector<40x11xf32>, vector<11x11xf32>, vector<40x11xf32> -> vector<40x11xf32>
    %68 = vector.broadcast %43 : vector<1x11xf32> to vector<40x11xf32>
    %69 = arith.addf %67, %68 : vector<40x11xf32>
    %70 = arith.addf %66, %69 : vector<40x11xf32>
    %cst_33 = arith.constant dense<0.000000e+00> : vector<40xf32>
    %71 = vector.multi_reduction <add>, %70, %cst_33 [1] : vector<40x11xf32> to vector<40xf32>
    %72 = vector.shape_cast %71 : vector<40xf32> to vector<40x1xf32>
    %cst_34 = arith.constant 1.100000e+01 : f32
    %73 = vector.broadcast %cst_34 : f32 to vector<40x1xf32>
    %74 = arith.divf %72, %73 : vector<40x1xf32>
    %75 = vector.broadcast %74 : vector<40x1xf32> to vector<40x11xf32>
    %76 = arith.subf %70, %75 : vector<40x11xf32>
    %77 = arith.mulf %76, %76 : vector<40x11xf32>
    %cst_35 = arith.constant dense<0.000000e+00> : vector<40xf32>
    %78 = vector.multi_reduction <add>, %77, %cst_35 [1] : vector<40x11xf32> to vector<40xf32>
    %79 = vector.shape_cast %78 : vector<40xf32> to vector<40x1xf32>
    %cst_36 = arith.constant 1.100000e+01 : f32
    %80 = vector.broadcast %cst_36 : f32 to vector<40x1xf32>
    %81 = arith.divf %79, %80 : vector<40x1xf32>
    %82 = vector.broadcast %74 : vector<40x1xf32> to vector<40x11xf32>
    %83 = arith.subf %70, %82 : vector<40x11xf32>
    %cst_37 = arith.constant 9.99999974E-6 : f32
    %84 = vector.broadcast %cst_37 : f32 to vector<40x1xf32>
    %85 = arith.addf %81, %84 : vector<40x1xf32>
    %86 = math.rsqrt %85 : vector<40x1xf32>
    %87 = vector.broadcast %86 : vector<40x1xf32> to vector<40x11xf32>
    %88 = arith.mulf %83, %87 : vector<40x11xf32>
    %89 = vector.broadcast %40 : vector<1x11xf32> to vector<40x11xf32>
    %90 = arith.mulf %88, %89 : vector<40x11xf32>
    %91 = vector.broadcast %41 : vector<1x11xf32> to vector<40x11xf32>
    %92 = arith.addf %90, %91 : vector<40x11xf32>
    %c240 = arith.constant 240 : index
    %c0_38 = arith.constant 0 : index
    %93 = vector.load %arg1[%c240, %c0_38] : memref<280x128xf32, #tpu.memory_space<vmem>>, vector<40x40xf32>
    %cst_39 = arith.constant dense<0.000000e+00> : vector<40x11xf32>
    %94 = tpu.matmul %93, %92, %cst_39 {dimension_numbers = #tpu.dot_dimension_numbers<[1], [0], [0], [1], [0, 0, 1, 1], [], []>} : vector<40x40xf32>, vector<40x11xf32>, vector<40x11xf32> -> vector<40x11xf32>
    %c96 = arith.constant 96 : index
    %c0_40 = arith.constant 0 : index
    %95 = vector.load %arg1[%c96, %c0_40] : memref<280x128xf32, #tpu.memory_space<vmem>>, vector<11x128xf32>
    %c112 = arith.constant 112 : index
    %c0_41 = arith.constant 0 : index
    %96 = vector.load %arg1[%c112, %c0_41] : memref<280x128xf32, #tpu.memory_space<vmem>>, vector<32x128xf32>
    %c153 = arith.constant 153 : index
    %c0_42 = arith.constant 0 : index
    %97 = vector.load %arg1[%c153, %c0_42] : memref<280x128xf32, #tpu.memory_space<vmem>>, vector<1x128xf32>
    %cst_43 = arith.constant dense<0.000000e+00> : vector<40x128xf32>
    %98 = tpu.matmul %94, %95, %cst_43 {dimension_numbers = #tpu.dot_dimension_numbers<[1], [0], [0], [1], [0, 0, 1, 1], [], []>} : vector<40x11xf32>, vector<11x128xf32>, vector<40x128xf32> -> vector<40x128xf32>
    %99 = vector.broadcast %97 : vector<1x128xf32> to vector<40x128xf32>
    %100 = arith.addf %98, %99 : vector<40x128xf32>
    %101 = tpu.iota {dimensions = array<i32: 1>} : vector<2x128xi32>
    %c96_i32 = arith.constant 96 : i32
    %102 = vector.broadcast %c96_i32 : i32 to vector<2x128xi32>
    %103 = arith.cmpi slt, %101, %102 : vector<2x128xi32>
    %cst_44 = arith.constant 5.000000e-01 : f32
    %cst_45 = arith.constant 1.000000e+00 : f32
    %104 = vector.broadcast %cst_44 : f32 to vector<2x128xf32>
    %105 = vector.broadcast %cst_45 : f32 to vector<2x128xf32>
    %106 = arith.select %103, %104, %105 : vector<2x128xi1>, vector<2x128xf32>
    %c96_i32_46 = arith.constant 96 : i32
    %107 = vector.broadcast %c96_i32_46 : i32 to vector<2x128xi32>
    %108 = arith.cmpi slt, %101, %107 : vector<2x128xi32>
    %cst_47 = arith.constant 5.000000e-01 : f32
    %cst_48 = arith.constant 0.000000e+00 : f32
    %109 = vector.broadcast %cst_47 : f32 to vector<2x128xf32>
    %110 = vector.broadcast %cst_48 : f32 to vector<2x128xf32>
    %111 = arith.select %108, %109, %110 : vector<2x128xi1>, vector<2x128xf32>
    %112 = vector.extract_strided_slice %100 {offsets = [0, 0], sizes = [2, 128], strides = [1, 1]} : vector<40x128xf32> to vector<2x128xf32>
    %113 = arith.mulf %112, %106 : vector<2x128xf32>
    %114 = math.tanh %113 : vector<2x128xf32>
    %115 = arith.mulf %114, %106 : vector<2x128xf32>
    %116 = arith.addf %115, %111 : vector<2x128xf32>
    %117 = vector.extract_strided_slice %116 {offsets = [0, 32], sizes = [2, 32], strides = [1, 1]} : vector<2x128xf32> to vector<2x32xf32>
    %118 = vector.extract_strided_slice %116 {offsets = [0, 96], sizes = [2, 32], strides = [1, 1]} : vector<2x128xf32> to vector<2x32xf32>
    %119 = arith.mulf %117, %118 : vector<2x32xf32>
    %120 = vector.extract_strided_slice %116 {offsets = [0, 64], sizes = [2, 32], strides = [1, 1]} : vector<2x128xf32> to vector<2x32xf32>
    %121 = math.tanh %119 : vector<2x32xf32>
    %122 = arith.mulf %120, %121 : vector<2x32xf32>
    %123 = vector.extract_strided_slice %100 {offsets = [2, 0], sizes = [2, 128], strides = [1, 1]} : vector<40x128xf32> to vector<2x128xf32>
    %cst_49 = arith.constant dense<0.000000e+00> : vector<2x128xf32>
    %124 = tpu.matmul %122, %96, %cst_49 {dimension_numbers = #tpu.dot_dimension_numbers<[1], [0], [0], [1], [0, 0, 1, 1], [], []>} : vector<2x32xf32>, vector<32x128xf32>, vector<2x128xf32> -> vector<2x128xf32>
    %125 = arith.addf %123, %124 : vector<2x128xf32>
    %126 = arith.mulf %125, %106 : vector<2x128xf32>
    %127 = math.tanh %126 : vector<2x128xf32>
    %128 = arith.mulf %127, %106 : vector<2x128xf32>
    %129 = arith.addf %128, %111 : vector<2x128xf32>
    %130 = vector.extract_strided_slice %129 {offsets = [0, 0], sizes = [2, 32], strides = [1, 1]} : vector<2x128xf32> to vector<2x32xf32>
    %131 = arith.mulf %130, %119 : vector<2x32xf32>
    %132 = vector.extract_strided_slice %129 {offsets = [0, 32], sizes = [2, 32], strides = [1, 1]} : vector<2x128xf32> to vector<2x32xf32>
    %133 = vector.extract_strided_slice %129 {offsets = [0, 96], sizes = [2, 32], strides = [1, 1]} : vector<2x128xf32> to vector<2x32xf32>
    %134 = arith.mulf %132, %133 : vector<2x32xf32>
    %135 = arith.addf %131, %134 : vector<2x32xf32>
    %136 = vector.extract_strided_slice %129 {offsets = [0, 64], sizes = [2, 32], strides = [1, 1]} : vector<2x128xf32> to vector<2x32xf32>
    %137 = math.tanh %135 : vector<2x32xf32>
    %138 = arith.mulf %136, %137 : vector<2x32xf32>
    %139 = vector.extract_strided_slice %100 {offsets = [4, 0], sizes = [2, 128], strides = [1, 1]} : vector<40x128xf32> to vector<2x128xf32>
    %cst_50 = arith.constant dense<0.000000e+00> : vector<2x128xf32>
    %140 = tpu.matmul %138, %96, %cst_50 {dimension_numbers = #tpu.dot_dimension_numbers<[1], [0], [0], [1], [0, 0, 1, 1], [], []>} : vector<2x32xf32>, vector<32x128xf32>, vector<2x128xf32> -> vector<2x128xf32>
    %141 = arith.addf %139, %140 : vector<2x128xf32>
    %142 = arith.mulf %141, %106 : vector<2x128xf32>
    %143 = math.tanh %142 : vector<2x128xf32>
    %144 = arith.mulf %143, %106 : vector<2x128xf32>
    %145 = arith.addf %144, %111 : vector<2x128xf32>
    %146 = vector.extract_strided_slice %145 {offsets = [0, 0], sizes = [2, 32], strides = [1, 1]} : vector<2x128xf32> to vector<2x32xf32>
    %147 = arith.mulf %146, %135 : vector<2x32xf32>
    %148 = vector.extract_strided_slice %145 {offsets = [0, 32], sizes = [2, 32], strides = [1, 1]} : vector<2x128xf32> to vector<2x32xf32>
    %149 = vector.extract_strided_slice %145 {offsets = [0, 96], sizes = [2, 32], strides = [1, 1]} : vector<2x128xf32> to vector<2x32xf32>
    %150 = arith.mulf %148, %149 : vector<2x32xf32>
    %151 = arith.addf %147, %150 : vector<2x32xf32>
    %152 = vector.extract_strided_slice %145 {offsets = [0, 64], sizes = [2, 32], strides = [1, 1]} : vector<2x128xf32> to vector<2x32xf32>
    %153 = math.tanh %151 : vector<2x32xf32>
    %154 = arith.mulf %152, %153 : vector<2x32xf32>
    %155 = vector.extract_strided_slice %100 {offsets = [6, 0], sizes = [2, 128], strides = [1, 1]} : vector<40x128xf32> to vector<2x128xf32>
    %cst_51 = arith.constant dense<0.000000e+00> : vector<2x128xf32>
    %156 = tpu.matmul %154, %96, %cst_51 {dimension_numbers = #tpu.dot_dimension_numbers<[1], [0], [0], [1], [0, 0, 1, 1], [], []>} : vector<2x32xf32>, vector<32x128xf32>, vector<2x128xf32> -> vector<2x128xf32>
    %157 = arith.addf %155, %156 : vector<2x128xf32>
    %158 = arith.mulf %157, %106 : vector<2x128xf32>
    %159 = math.tanh %158 : vector<2x128xf32>
    %160 = arith.mulf %159, %106 : vector<2x128xf32>
    %161 = arith.addf %160, %111 : vector<2x128xf32>
    %162 = vector.extract_strided_slice %161 {offsets = [0, 0], sizes = [2, 32], strides = [1, 1]} : vector<2x128xf32> to vector<2x32xf32>
    %163 = arith.mulf %162, %151 : vector<2x32xf32>
    %164 = vector.extract_strided_slice %161 {offsets = [0, 32], sizes = [2, 32], strides = [1, 1]} : vector<2x128xf32> to vector<2x32xf32>
    %165 = vector.extract_strided_slice %161 {offsets = [0, 96], sizes = [2, 32], strides = [1, 1]} : vector<2x128xf32> to vector<2x32xf32>
    %166 = arith.mulf %164, %165 : vector<2x32xf32>
    %167 = arith.addf %163, %166 : vector<2x32xf32>
    %168 = vector.extract_strided_slice %161 {offsets = [0, 64], sizes = [2, 32], strides = [1, 1]} : vector<2x128xf32> to vector<2x32xf32>
    %169 = math.tanh %167 : vector<2x32xf32>
    %170 = arith.mulf %168, %169 : vector<2x32xf32>
    %171 = vector.extract_strided_slice %100 {offsets = [8, 0], sizes = [2, 128], strides = [1, 1]} : vector<40x128xf32> to vector<2x128xf32>
    %cst_52 = arith.constant dense<0.000000e+00> : vector<2x128xf32>
    %172 = tpu.matmul %170, %96, %cst_52 {dimension_numbers = #tpu.dot_dimension_numbers<[1], [0], [0], [1], [0, 0, 1, 1], [], []>} : vector<2x32xf32>, vector<32x128xf32>, vector<2x128xf32> -> vector<2x128xf32>
    %173 = arith.addf %171, %172 : vector<2x128xf32>
    %174 = arith.mulf %173, %106 : vector<2x128xf32>
    %175 = math.tanh %174 : vector<2x128xf32>
    %176 = arith.mulf %175, %106 : vector<2x128xf32>
    %177 = arith.addf %176, %111 : vector<2x128xf32>
    %178 = vector.extract_strided_slice %177 {offsets = [0, 0], sizes = [2, 32], strides = [1, 1]} : vector<2x128xf32> to vector<2x32xf32>
    %179 = arith.mulf %178, %167 : vector<2x32xf32>
    %180 = vector.extract_strided_slice %177 {offsets = [0, 32], sizes = [2, 32], strides = [1, 1]} : vector<2x128xf32> to vector<2x32xf32>
    %181 = vector.extract_strided_slice %177 {offsets = [0, 96], sizes = [2, 32], strides = [1, 1]} : vector<2x128xf32> to vector<2x32xf32>
    %182 = arith.mulf %180, %181 : vector<2x32xf32>
    %183 = arith.addf %179, %182 : vector<2x32xf32>
    %184 = vector.extract_strided_slice %177 {offsets = [0, 64], sizes = [2, 32], strides = [1, 1]} : vector<2x128xf32> to vector<2x32xf32>
    %185 = math.tanh %183 : vector<2x32xf32>
    %186 = arith.mulf %184, %185 : vector<2x32xf32>
    %187 = vector.extract_strided_slice %100 {offsets = [10, 0], sizes = [2, 128], strides = [1, 1]} : vector<40x128xf32> to vector<2x128xf32>
    %cst_53 = arith.constant dense<0.000000e+00> : vector<2x128xf32>
    %188 = tpu.matmul %186, %96, %cst_53 {dimension_numbers = #tpu.dot_dimension_numbers<[1], [0], [0], [1], [0, 0, 1, 1], [], []>} : vector<2x32xf32>, vector<32x128xf32>, vector<2x128xf32> -> vector<2x128xf32>
    %189 = arith.addf %187, %188 : vector<2x128xf32>
    %190 = arith.mulf %189, %106 : vector<2x128xf32>
    %191 = math.tanh %190 : vector<2x128xf32>
    %192 = arith.mulf %191, %106 : vector<2x128xf32>
    %193 = arith.addf %192, %111 : vector<2x128xf32>
    %194 = vector.extract_strided_slice %193 {offsets = [0, 0], sizes = [2, 32], strides = [1, 1]} : vector<2x128xf32> to vector<2x32xf32>
    %195 = arith.mulf %194, %183 : vector<2x32xf32>
    %196 = vector.extract_strided_slice %193 {offsets = [0, 32], sizes = [2, 32], strides = [1, 1]} : vector<2x128xf32> to vector<2x32xf32>
    %197 = vector.extract_strided_slice %193 {offsets = [0, 96], sizes = [2, 32], strides = [1, 1]} : vector<2x128xf32> to vector<2x32xf32>
    %198 = arith.mulf %196, %197 : vector<2x32xf32>
    %199 = arith.addf %195, %198 : vector<2x32xf32>
    %200 = vector.extract_strided_slice %193 {offsets = [0, 64], sizes = [2, 32], strides = [1, 1]} : vector<2x128xf32> to vector<2x32xf32>
    %201 = math.tanh %199 : vector<2x32xf32>
    %202 = arith.mulf %200, %201 : vector<2x32xf32>
    %203 = vector.extract_strided_slice %100 {offsets = [12, 0], sizes = [2, 128], strides = [1, 1]} : vector<40x128xf32> to vector<2x128xf32>
    %cst_54 = arith.constant dense<0.000000e+00> : vector<2x128xf32>
    %204 = tpu.matmul %202, %96, %cst_54 {dimension_numbers = #tpu.dot_dimension_numbers<[1], [0], [0], [1], [0, 0, 1, 1], [], []>} : vector<2x32xf32>, vector<32x128xf32>, vector<2x128xf32> -> vector<2x128xf32>
    %205 = arith.addf %203, %204 : vector<2x128xf32>
    %206 = arith.mulf %205, %106 : vector<2x128xf32>
    %207 = math.tanh %206 : vector<2x128xf32>
    %208 = arith.mulf %207, %106 : vector<2x128xf32>
    %209 = arith.addf %208, %111 : vector<2x128xf32>
    %210 = vector.extract_strided_slice %209 {offsets = [0, 0], sizes = [2, 32], strides = [1, 1]} : vector<2x128xf32> to vector<2x32xf32>
    %211 = arith.mulf %210, %199 : vector<2x32xf32>
    %212 = vector.extract_strided_slice %209 {offsets = [0, 32], sizes = [2, 32], strides = [1, 1]} : vector<2x128xf32> to vector<2x32xf32>
    %213 = vector.extract_strided_slice %209 {offsets = [0, 96], sizes = [2, 32], strides = [1, 1]} : vector<2x128xf32> to vector<2x32xf32>
    %214 = arith.mulf %212, %213 : vector<2x32xf32>
    %215 = arith.addf %211, %214 : vector<2x32xf32>
    %216 = vector.extract_strided_slice %209 {offsets = [0, 64], sizes = [2, 32], strides = [1, 1]} : vector<2x128xf32> to vector<2x32xf32>
    %217 = math.tanh %215 : vector<2x32xf32>
    %218 = arith.mulf %216, %217 : vector<2x32xf32>
    %219 = vector.extract_strided_slice %100 {offsets = [14, 0], sizes = [2, 128], strides = [1, 1]} : vector<40x128xf32> to vector<2x128xf32>
    %cst_55 = arith.constant dense<0.000000e+00> : vector<2x128xf32>
    %220 = tpu.matmul %218, %96, %cst_55 {dimension_numbers = #tpu.dot_dimension_numbers<[1], [0], [0], [1], [0, 0, 1, 1], [], []>} : vector<2x32xf32>, vector<32x128xf32>, vector<2x128xf32> -> vector<2x128xf32>
    %221 = arith.addf %219, %220 : vector<2x128xf32>
    %222 = arith.mulf %221, %106 : vector<2x128xf32>
    %223 = math.tanh %222 : vector<2x128xf32>
    %224 = arith.mulf %223, %106 : vector<2x128xf32>
    %225 = arith.addf %224, %111 : vector<2x128xf32>
    %226 = vector.extract_strided_slice %225 {offsets = [0, 0], sizes = [2, 32], strides = [1, 1]} : vector<2x128xf32> to vector<2x32xf32>
    %227 = arith.mulf %226, %215 : vector<2x32xf32>
    %228 = vector.extract_strided_slice %225 {offsets = [0, 32], sizes = [2, 32], strides = [1, 1]} : vector<2x128xf32> to vector<2x32xf32>
    %229 = vector.extract_strided_slice %225 {offsets = [0, 96], sizes = [2, 32], strides = [1, 1]} : vector<2x128xf32> to vector<2x32xf32>
    %230 = arith.mulf %228, %229 : vector<2x32xf32>
    %231 = arith.addf %227, %230 : vector<2x32xf32>
    %232 = vector.extract_strided_slice %225 {offsets = [0, 64], sizes = [2, 32], strides = [1, 1]} : vector<2x128xf32> to vector<2x32xf32>
    %233 = math.tanh %231 : vector<2x32xf32>
    %234 = arith.mulf %232, %233 : vector<2x32xf32>
    %235 = vector.extract_strided_slice %100 {offsets = [16, 0], sizes = [2, 128], strides = [1, 1]} : vector<40x128xf32> to vector<2x128xf32>
    %cst_56 = arith.constant dense<0.000000e+00> : vector<2x128xf32>
    %236 = tpu.matmul %234, %96, %cst_56 {dimension_numbers = #tpu.dot_dimension_numbers<[1], [0], [0], [1], [0, 0, 1, 1], [], []>} : vector<2x32xf32>, vector<32x128xf32>, vector<2x128xf32> -> vector<2x128xf32>
    %237 = arith.addf %235, %236 : vector<2x128xf32>
    %238 = arith.mulf %237, %106 : vector<2x128xf32>
    %239 = math.tanh %238 : vector<2x128xf32>
    %240 = arith.mulf %239, %106 : vector<2x128xf32>
    %241 = arith.addf %240, %111 : vector<2x128xf32>
    %242 = vector.extract_strided_slice %241 {offsets = [0, 0], sizes = [2, 32], strides = [1, 1]} : vector<2x128xf32> to vector<2x32xf32>
    %243 = arith.mulf %242, %231 : vector<2x32xf32>
    %244 = vector.extract_strided_slice %241 {offsets = [0, 32], sizes = [2, 32], strides = [1, 1]} : vector<2x128xf32> to vector<2x32xf32>
    %245 = vector.extract_strided_slice %241 {offsets = [0, 96], sizes = [2, 32], strides = [1, 1]} : vector<2x128xf32> to vector<2x32xf32>
    %246 = arith.mulf %244, %245 : vector<2x32xf32>
    %247 = arith.addf %243, %246 : vector<2x32xf32>
    %248 = vector.extract_strided_slice %241 {offsets = [0, 64], sizes = [2, 32], strides = [1, 1]} : vector<2x128xf32> to vector<2x32xf32>
    %249 = math.tanh %247 : vector<2x32xf32>
    %250 = arith.mulf %248, %249 : vector<2x32xf32>
    %251 = vector.extract_strided_slice %100 {offsets = [18, 0], sizes = [2, 128], strides = [1, 1]} : vector<40x128xf32> to vector<2x128xf32>
    %cst_57 = arith.constant dense<0.000000e+00> : vector<2x128xf32>
    %252 = tpu.matmul %250, %96, %cst_57 {dimension_numbers = #tpu.dot_dimension_numbers<[1], [0], [0], [1], [0, 0, 1, 1], [], []>} : vector<2x32xf32>, vector<32x128xf32>, vector<2x128xf32> -> vector<2x128xf32>
    %253 = arith.addf %251, %252 : vector<2x128xf32>
    %254 = arith.mulf %253, %106 : vector<2x128xf32>
    %255 = math.tanh %254 : vector<2x128xf32>
    %256 = arith.mulf %255, %106 : vector<2x128xf32>
    %257 = arith.addf %256, %111 : vector<2x128xf32>
    %258 = vector.extract_strided_slice %257 {offsets = [0, 0], sizes = [2, 32], strides = [1, 1]} : vector<2x128xf32> to vector<2x32xf32>
    %259 = arith.mulf %258, %247 : vector<2x32xf32>
    %260 = vector.extract_strided_slice %257 {offsets = [0, 32], sizes = [2, 32], strides = [1, 1]} : vector<2x128xf32> to vector<2x32xf32>
    %261 = vector.extract_strided_slice %257 {offsets = [0, 96], sizes = [2, 32], strides = [1, 1]} : vector<2x128xf32> to vector<2x32xf32>
    %262 = arith.mulf %260, %261 : vector<2x32xf32>
    %263 = arith.addf %259, %262 : vector<2x32xf32>
    %264 = vector.extract_strided_slice %257 {offsets = [0, 64], sizes = [2, 32], strides = [1, 1]} : vector<2x128xf32> to vector<2x32xf32>
    %265 = math.tanh %263 : vector<2x32xf32>
    %266 = arith.mulf %264, %265 : vector<2x32xf32>
    %267 = vector.extract_strided_slice %100 {offsets = [20, 0], sizes = [2, 128], strides = [1, 1]} : vector<40x128xf32> to vector<2x128xf32>
    %cst_58 = arith.constant dense<0.000000e+00> : vector<2x128xf32>
    %268 = tpu.matmul %266, %96, %cst_58 {dimension_numbers = #tpu.dot_dimension_numbers<[1], [0], [0], [1], [0, 0, 1, 1], [], []>} : vector<2x32xf32>, vector<32x128xf32>, vector<2x128xf32> -> vector<2x128xf32>
    %269 = arith.addf %267, %268 : vector<2x128xf32>
    %270 = arith.mulf %269, %106 : vector<2x128xf32>
    %271 = math.tanh %270 : vector<2x128xf32>
    %272 = arith.mulf %271, %106 : vector<2x128xf32>
    %273 = arith.addf %272, %111 : vector<2x128xf32>
    %274 = vector.extract_strided_slice %273 {offsets = [0, 0], sizes = [2, 32], strides = [1, 1]} : vector<2x128xf32> to vector<2x32xf32>
    %275 = arith.mulf %274, %263 : vector<2x32xf32>
    %276 = vector.extract_strided_slice %273 {offsets = [0, 32], sizes = [2, 32], strides = [1, 1]} : vector<2x128xf32> to vector<2x32xf32>
    %277 = vector.extract_strided_slice %273 {offsets = [0, 96], sizes = [2, 32], strides = [1, 1]} : vector<2x128xf32> to vector<2x32xf32>
    %278 = arith.mulf %276, %277 : vector<2x32xf32>
    %279 = arith.addf %275, %278 : vector<2x32xf32>
    %280 = vector.extract_strided_slice %273 {offsets = [0, 64], sizes = [2, 32], strides = [1, 1]} : vector<2x128xf32> to vector<2x32xf32>
    %281 = math.tanh %279 : vector<2x32xf32>
    %282 = arith.mulf %280, %281 : vector<2x32xf32>
    %283 = vector.extract_strided_slice %100 {offsets = [22, 0], sizes = [2, 128], strides = [1, 1]} : vector<40x128xf32> to vector<2x128xf32>
    %cst_59 = arith.constant dense<0.000000e+00> : vector<2x128xf32>
    %284 = tpu.matmul %282, %96, %cst_59 {dimension_numbers = #tpu.dot_dimension_numbers<[1], [0], [0], [1], [0, 0, 1, 1], [], []>} : vector<2x32xf32>, vector<32x128xf32>, vector<2x128xf32> -> vector<2x128xf32>
    %285 = arith.addf %283, %284 : vector<2x128xf32>
    %286 = arith.mulf %285, %106 : vector<2x128xf32>
    %287 = math.tanh %286 : vector<2x128xf32>
    %288 = arith.mulf %287, %106 : vector<2x128xf32>
    %289 = arith.addf %288, %111 : vector<2x128xf32>
    %290 = vector.extract_strided_slice %289 {offsets = [0, 0], sizes = [2, 32], strides = [1, 1]} : vector<2x128xf32> to vector<2x32xf32>
    %291 = arith.mulf %290, %279 : vector<2x32xf32>
    %292 = vector.extract_strided_slice %289 {offsets = [0, 32], sizes = [2, 32], strides = [1, 1]} : vector<2x128xf32> to vector<2x32xf32>
    %293 = vector.extract_strided_slice %289 {offsets = [0, 96], sizes = [2, 32], strides = [1, 1]} : vector<2x128xf32> to vector<2x32xf32>
    %294 = arith.mulf %292, %293 : vector<2x32xf32>
    %295 = arith.addf %291, %294 : vector<2x32xf32>
    %296 = vector.extract_strided_slice %289 {offsets = [0, 64], sizes = [2, 32], strides = [1, 1]} : vector<2x128xf32> to vector<2x32xf32>
    %297 = math.tanh %295 : vector<2x32xf32>
    %298 = arith.mulf %296, %297 : vector<2x32xf32>
    %299 = vector.extract_strided_slice %100 {offsets = [24, 0], sizes = [2, 128], strides = [1, 1]} : vector<40x128xf32> to vector<2x128xf32>
    %cst_60 = arith.constant dense<0.000000e+00> : vector<2x128xf32>
    %300 = tpu.matmul %298, %96, %cst_60 {dimension_numbers = #tpu.dot_dimension_numbers<[1], [0], [0], [1], [0, 0, 1, 1], [], []>} : vector<2x32xf32>, vector<32x128xf32>, vector<2x128xf32> -> vector<2x128xf32>
    %301 = arith.addf %299, %300 : vector<2x128xf32>
    %302 = arith.mulf %301, %106 : vector<2x128xf32>
    %303 = math.tanh %302 : vector<2x128xf32>
    %304 = arith.mulf %303, %106 : vector<2x128xf32>
    %305 = arith.addf %304, %111 : vector<2x128xf32>
    %306 = vector.extract_strided_slice %305 {offsets = [0, 0], sizes = [2, 32], strides = [1, 1]} : vector<2x128xf32> to vector<2x32xf32>
    %307 = arith.mulf %306, %295 : vector<2x32xf32>
    %308 = vector.extract_strided_slice %305 {offsets = [0, 32], sizes = [2, 32], strides = [1, 1]} : vector<2x128xf32> to vector<2x32xf32>
    %309 = vector.extract_strided_slice %305 {offsets = [0, 96], sizes = [2, 32], strides = [1, 1]} : vector<2x128xf32> to vector<2x32xf32>
    %310 = arith.mulf %308, %309 : vector<2x32xf32>
    %311 = arith.addf %307, %310 : vector<2x32xf32>
    %312 = vector.extract_strided_slice %305 {offsets = [0, 64], sizes = [2, 32], strides = [1, 1]} : vector<2x128xf32> to vector<2x32xf32>
    %313 = math.tanh %311 : vector<2x32xf32>
    %314 = arith.mulf %312, %313 : vector<2x32xf32>
    %315 = vector.extract_strided_slice %100 {offsets = [26, 0], sizes = [2, 128], strides = [1, 1]} : vector<40x128xf32> to vector<2x128xf32>
    %cst_61 = arith.constant dense<0.000000e+00> : vector<2x128xf32>
    %316 = tpu.matmul %314, %96, %cst_61 {dimension_numbers = #tpu.dot_dimension_numbers<[1], [0], [0], [1], [0, 0, 1, 1], [], []>} : vector<2x32xf32>, vector<32x128xf32>, vector<2x128xf32> -> vector<2x128xf32>
    %317 = arith.addf %315, %316 : vector<2x128xf32>
    %318 = arith.mulf %317, %106 : vector<2x128xf32>
    %319 = math.tanh %318 : vector<2x128xf32>
    %320 = arith.mulf %319, %106 : vector<2x128xf32>
    %321 = arith.addf %320, %111 : vector<2x128xf32>
    %322 = vector.extract_strided_slice %321 {offsets = [0, 0], sizes = [2, 32], strides = [1, 1]} : vector<2x128xf32> to vector<2x32xf32>
    %323 = arith.mulf %322, %311 : vector<2x32xf32>
    %324 = vector.extract_strided_slice %321 {offsets = [0, 32], sizes = [2, 32], strides = [1, 1]} : vector<2x128xf32> to vector<2x32xf32>
    %325 = vector.extract_strided_slice %321 {offsets = [0, 96], sizes = [2, 32], strides = [1, 1]} : vector<2x128xf32> to vector<2x32xf32>
    %326 = arith.mulf %324, %325 : vector<2x32xf32>
    %327 = arith.addf %323, %326 : vector<2x32xf32>
    %328 = vector.extract_strided_slice %321 {offsets = [0, 64], sizes = [2, 32], strides = [1, 1]} : vector<2x128xf32> to vector<2x32xf32>
    %329 = math.tanh %327 : vector<2x32xf32>
    %330 = arith.mulf %328, %329 : vector<2x32xf32>
    %331 = vector.extract_strided_slice %100 {offsets = [28, 0], sizes = [2, 128], strides = [1, 1]} : vector<40x128xf32> to vector<2x128xf32>
    %cst_62 = arith.constant dense<0.000000e+00> : vector<2x128xf32>
    %332 = tpu.matmul %330, %96, %cst_62 {dimension_numbers = #tpu.dot_dimension_numbers<[1], [0], [0], [1], [0, 0, 1, 1], [], []>} : vector<2x32xf32>, vector<32x128xf32>, vector<2x128xf32> -> vector<2x128xf32>
    %333 = arith.addf %331, %332 : vector<2x128xf32>
    %334 = arith.mulf %333, %106 : vector<2x128xf32>
    %335 = math.tanh %334 : vector<2x128xf32>
    %336 = arith.mulf %335, %106 : vector<2x128xf32>
    %337 = arith.addf %336, %111 : vector<2x128xf32>
    %338 = vector.extract_strided_slice %337 {offsets = [0, 0], sizes = [2, 32], strides = [1, 1]} : vector<2x128xf32> to vector<2x32xf32>
    %339 = arith.mulf %338, %327 : vector<2x32xf32>
    %340 = vector.extract_strided_slice %337 {offsets = [0, 32], sizes = [2, 32], strides = [1, 1]} : vector<2x128xf32> to vector<2x32xf32>
    %341 = vector.extract_strided_slice %337 {offsets = [0, 96], sizes = [2, 32], strides = [1, 1]} : vector<2x128xf32> to vector<2x32xf32>
    %342 = arith.mulf %340, %341 : vector<2x32xf32>
    %343 = arith.addf %339, %342 : vector<2x32xf32>
    %344 = vector.extract_strided_slice %337 {offsets = [0, 64], sizes = [2, 32], strides = [1, 1]} : vector<2x128xf32> to vector<2x32xf32>
    %345 = math.tanh %343 : vector<2x32xf32>
    %346 = arith.mulf %344, %345 : vector<2x32xf32>
    %347 = vector.extract_strided_slice %100 {offsets = [30, 0], sizes = [2, 128], strides = [1, 1]} : vector<40x128xf32> to vector<2x128xf32>
    %cst_63 = arith.constant dense<0.000000e+00> : vector<2x128xf32>
    %348 = tpu.matmul %346, %96, %cst_63 {dimension_numbers = #tpu.dot_dimension_numbers<[1], [0], [0], [1], [0, 0, 1, 1], [], []>} : vector<2x32xf32>, vector<32x128xf32>, vector<2x128xf32> -> vector<2x128xf32>
    %349 = arith.addf %347, %348 : vector<2x128xf32>
    %350 = arith.mulf %349, %106 : vector<2x128xf32>
    %351 = math.tanh %350 : vector<2x128xf32>
    %352 = arith.mulf %351, %106 : vector<2x128xf32>
    %353 = arith.addf %352, %111 : vector<2x128xf32>
    %354 = vector.extract_strided_slice %353 {offsets = [0, 0], sizes = [2, 32], strides = [1, 1]} : vector<2x128xf32> to vector<2x32xf32>
    %355 = arith.mulf %354, %343 : vector<2x32xf32>
    %356 = vector.extract_strided_slice %353 {offsets = [0, 32], sizes = [2, 32], strides = [1, 1]} : vector<2x128xf32> to vector<2x32xf32>
    %357 = vector.extract_strided_slice %353 {offsets = [0, 96], sizes = [2, 32], strides = [1, 1]} : vector<2x128xf32> to vector<2x32xf32>
    %358 = arith.mulf %356, %357 : vector<2x32xf32>
    %359 = arith.addf %355, %358 : vector<2x32xf32>
    %360 = vector.extract_strided_slice %353 {offsets = [0, 64], sizes = [2, 32], strides = [1, 1]} : vector<2x128xf32> to vector<2x32xf32>
    %361 = math.tanh %359 : vector<2x32xf32>
    %362 = arith.mulf %360, %361 : vector<2x32xf32>
    %363 = vector.extract_strided_slice %100 {offsets = [32, 0], sizes = [2, 128], strides = [1, 1]} : vector<40x128xf32> to vector<2x128xf32>
    %cst_64 = arith.constant dense<0.000000e+00> : vector<2x128xf32>
    %364 = tpu.matmul %362, %96, %cst_64 {dimension_numbers = #tpu.dot_dimension_numbers<[1], [0], [0], [1], [0, 0, 1, 1], [], []>} : vector<2x32xf32>, vector<32x128xf32>, vector<2x128xf32> -> vector<2x128xf32>
    %365 = arith.addf %363, %364 : vector<2x128xf32>
    %366 = arith.mulf %365, %106 : vector<2x128xf32>
    %367 = math.tanh %366 : vector<2x128xf32>
    %368 = arith.mulf %367, %106 : vector<2x128xf32>
    %369 = arith.addf %368, %111 : vector<2x128xf32>
    %370 = vector.extract_strided_slice %369 {offsets = [0, 0], sizes = [2, 32], strides = [1, 1]} : vector<2x128xf32> to vector<2x32xf32>
    %371 = arith.mulf %370, %359 : vector<2x32xf32>
    %372 = vector.extract_strided_slice %369 {offsets = [0, 32], sizes = [2, 32], strides = [1, 1]} : vector<2x128xf32> to vector<2x32xf32>
    %373 = vector.extract_strided_slice %369 {offsets = [0, 96], sizes = [2, 32], strides = [1, 1]} : vector<2x128xf32> to vector<2x32xf32>
    %374 = arith.mulf %372, %373 : vector<2x32xf32>
    %375 = arith.addf %371, %374 : vector<2x32xf32>
    %376 = vector.extract_strided_slice %369 {offsets = [0, 64], sizes = [2, 32], strides = [1, 1]} : vector<2x128xf32> to vector<2x32xf32>
    %377 = math.tanh %375 : vector<2x32xf32>
    %378 = arith.mulf %376, %377 : vector<2x32xf32>
    %379 = vector.extract_strided_slice %100 {offsets = [34, 0], sizes = [2, 128], strides = [1, 1]} : vector<40x128xf32> to vector<2x128xf32>
    %cst_65 = arith.constant dense<0.000000e+00> : vector<2x128xf32>
    %380 = tpu.matmul %378, %96, %cst_65 {dimension_numbers = #tpu.dot_dimension_numbers<[1], [0], [0], [1], [0, 0, 1, 1], [], []>} : vector<2x32xf32>, vector<32x128xf32>, vector<2x128xf32> -> vector<2x128xf32>
    %381 = arith.addf %379, %380 : vector<2x128xf32>
    %382 = arith.mulf %381, %106 : vector<2x128xf32>
    %383 = math.tanh %382 : vector<2x128xf32>
    %384 = arith.mulf %383, %106 : vector<2x128xf32>
    %385 = arith.addf %384, %111 : vector<2x128xf32>
    %386 = vector.extract_strided_slice %385 {offsets = [0, 0], sizes = [2, 32], strides = [1, 1]} : vector<2x128xf32> to vector<2x32xf32>
    %387 = arith.mulf %386, %375 : vector<2x32xf32>
    %388 = vector.extract_strided_slice %385 {offsets = [0, 32], sizes = [2, 32], strides = [1, 1]} : vector<2x128xf32> to vector<2x32xf32>
    %389 = vector.extract_strided_slice %385 {offsets = [0, 96], sizes = [2, 32], strides = [1, 1]} : vector<2x128xf32> to vector<2x32xf32>
    %390 = arith.mulf %388, %389 : vector<2x32xf32>
    %391 = arith.addf %387, %390 : vector<2x32xf32>
    %392 = vector.extract_strided_slice %385 {offsets = [0, 64], sizes = [2, 32], strides = [1, 1]} : vector<2x128xf32> to vector<2x32xf32>
    %393 = math.tanh %391 : vector<2x32xf32>
    %394 = arith.mulf %392, %393 : vector<2x32xf32>
    %395 = vector.extract_strided_slice %100 {offsets = [36, 0], sizes = [2, 128], strides = [1, 1]} : vector<40x128xf32> to vector<2x128xf32>
    %cst_66 = arith.constant dense<0.000000e+00> : vector<2x128xf32>
    %396 = tpu.matmul %394, %96, %cst_66 {dimension_numbers = #tpu.dot_dimension_numbers<[1], [0], [0], [1], [0, 0, 1, 1], [], []>} : vector<2x32xf32>, vector<32x128xf32>, vector<2x128xf32> -> vector<2x128xf32>
    %397 = arith.addf %395, %396 : vector<2x128xf32>
    %398 = arith.mulf %397, %106 : vector<2x128xf32>
    %399 = math.tanh %398 : vector<2x128xf32>
    %400 = arith.mulf %399, %106 : vector<2x128xf32>
    %401 = arith.addf %400, %111 : vector<2x128xf32>
    %402 = vector.extract_strided_slice %401 {offsets = [0, 0], sizes = [2, 32], strides = [1, 1]} : vector<2x128xf32> to vector<2x32xf32>
    %403 = arith.mulf %402, %391 : vector<2x32xf32>
    %404 = vector.extract_strided_slice %401 {offsets = [0, 32], sizes = [2, 32], strides = [1, 1]} : vector<2x128xf32> to vector<2x32xf32>
    %405 = vector.extract_strided_slice %401 {offsets = [0, 96], sizes = [2, 32], strides = [1, 1]} : vector<2x128xf32> to vector<2x32xf32>
    %406 = arith.mulf %404, %405 : vector<2x32xf32>
    %407 = arith.addf %403, %406 : vector<2x32xf32>
    %408 = vector.extract_strided_slice %401 {offsets = [0, 64], sizes = [2, 32], strides = [1, 1]} : vector<2x128xf32> to vector<2x32xf32>
    %409 = math.tanh %407 : vector<2x32xf32>
    %410 = arith.mulf %408, %409 : vector<2x32xf32>
    %411 = vector.extract_strided_slice %100 {offsets = [38, 0], sizes = [2, 128], strides = [1, 1]} : vector<40x128xf32> to vector<2x128xf32>
    %cst_67 = arith.constant dense<0.000000e+00> : vector<2x128xf32>
    %412 = tpu.matmul %410, %96, %cst_67 {dimension_numbers = #tpu.dot_dimension_numbers<[1], [0], [0], [1], [0, 0, 1, 1], [], []>} : vector<2x32xf32>, vector<32x128xf32>, vector<2x128xf32> -> vector<2x128xf32>
    %413 = arith.addf %411, %412 : vector<2x128xf32>
    %414 = arith.mulf %413, %106 : vector<2x128xf32>
    %415 = math.tanh %414 : vector<2x128xf32>
    %416 = arith.mulf %415, %106 : vector<2x128xf32>
    %417 = arith.addf %416, %111 : vector<2x128xf32>
    %418 = vector.extract_strided_slice %417 {offsets = [0, 0], sizes = [2, 32], strides = [1, 1]} : vector<2x128xf32> to vector<2x32xf32>
    %419 = arith.mulf %418, %407 : vector<2x32xf32>
    %420 = vector.extract_strided_slice %417 {offsets = [0, 32], sizes = [2, 32], strides = [1, 1]} : vector<2x128xf32> to vector<2x32xf32>
    %421 = vector.extract_strided_slice %417 {offsets = [0, 96], sizes = [2, 32], strides = [1, 1]} : vector<2x128xf32> to vector<2x32xf32>
    %422 = arith.mulf %420, %421 : vector<2x32xf32>
    %423 = arith.addf %419, %422 : vector<2x32xf32>
    %424 = vector.extract_strided_slice %417 {offsets = [0, 64], sizes = [2, 32], strides = [1, 1]} : vector<2x128xf32> to vector<2x32xf32>
    %425 = math.tanh %423 : vector<2x32xf32>
    %426 = arith.mulf %424, %425 : vector<2x32xf32>
    %c0_68 = arith.constant 0 : index
    %c0_69 = arith.constant 0 : index
    %427 = vector.load %arg2[%c0_68, %c0_69] : memref<2x32xf32, #tpu.memory_space<vmem>>, vector<2x32xf32>
    tpu.vector_store %arg2[%c0_68, %c0_69], %426 {strides = array<i32>} : memref<2x32xf32, #tpu.memory_space<vmem>>, vector<2x32xf32>,
    return
  }
}

</mosaic_0001>

<bundles_post_ra>
// kernel: attention_base_forward.1
= control target key start
LH: loop header
LB: loop body
LE: loop exit
PB: predicated region body
PF: predicated region fallthrough
CT: control target
= control target key end

     0   :  { %7 = vsyncpa [#allocation3], 0  ;;  %s5070_s0 = inlined_call_operand.vmem [shape: f32[40,10], index: 0, kind: input, shape index: {}]   ;;  %s5071_s1 = inlined_call_operand.hbm [shape: f32[280,128], index: 1, kind: input, shape index: {}]   ;;  %s5072_s2 = inlined_call_operand.hbm [shape: f32[2,32], index: 2, kind: output, shape index: {}]  }
   0x1   :  { %8 = vsyncpa [#allocation4], 0  ;;  %s4421_s9 = smov [#allocation2]   ;;  %s4373_s13 = scalar_lea.hbm %s5071_s1, 4480 }
   0x2   :  { %s16_s10 = sshll.u32 %s4421_s9, 4  ;;  %p4374_p0 = scmp.ne.s32.totalorder %s5071_s1, %s4373_s13  ;;  %s17_s10 = int_to_ptr.vmem [resolvable:$true] %s16_s10 }
   0x3   :  { %p4377_p1 = scmp.lt.u32.totalorder %s4373_s13, %s5071_s1 }
   0x5   :  { %p4379_p2 = pnand %p4377_p1, %p4374_p0 }
   0x7   :  { %4382 = shalt.err (!%p4379_p2)
}
   0x8   :  { %s4383_s18 = scalar_lea.vmem %s17_s10, 4480  ;;  %p4388_p4 = scmp.lt.s32.totalorder %s17_s10, %s17_s10 }
   0x9   :  { %p4384_p3 = scmp.ne.s32.totalorder %s17_s10, %s4383_s18  ;;  %p4389_p5 = scmp.lt.s32.totalorder %s4383_s18, %s4383_s18 }
   0xb   :  { %p4390_p6 = por %p4389_p5, %p4388_p4 }
   0xd   :  { %p4391_p7 = pnand %p4390_p6, %p4384_p3 }
   0xf   :  { %4394 = shalt.err (!%p4391_p7)
}
  0x10   :  { %s4422_s19 = smov 128   ;;  %s4423_s20 = smov 8  }
  0x11   :  { %22 = dma.hbm_to_vmem [thread:$0]  %s5071_s1, 4480, %s17_s10, [#allocation3], %s4422_s19, %s4422_s19, %s4423_s20  }
  0x12   :  { %4417 = dma.done.wait [#allocation3], 4480  }
  0x13   :  { %4418 = vsyncadd [#allocation3], 4294962816  ;;  %v4424_v0 = vmov 0.0|0.0   ;;  %vm4425_vm0 = vmmov 0   ;;  %v4426_v1 = vmov 0.0   ;;  %vm54_vm1 = vcmask 1041408  }
  0x14   :  { %4076 = vmatprep.subr.bf16.mxu0 %v4424_v0  ;;  %4238 = vmatprep.subr.bf16.mxu1 %v4424_v0  ;;  %v31_v2 = vld [vmem:[#allocation2] sm:$0xff]  ;;  %v32_v3 = vld [vmem:[#allocation2 + $0x8] sm:$0x3]  ;;  %vm4427_vm2 = vmmov 1   ;;  %vm177_vm4 = vcmask 1042432   ;;  %vm38_vm5 = vcmask 80896  }
  0x15   :  { %3663 = vmatprep.mubr.msk.f32.mxu0 %vm4425_vm0, %v4426_v1  ;;  %3675 = vmatprep.mubr.msk.f32.mxu1 %vm4425_vm0, %v4426_v1  ;;  %vm4078_vm3 = vmpackc.low %vm54_vm1, %vm4427_vm2  ;;  %v4077_v4 = vpack.c.bf16 %v32_v3, %v31_v2  ;;  %v150_v5 = vld [vmem:[#allocation2 + $0x20] sm:$0xff]  ;;  %v151_v6 = vld [vmem:[#allocation2 + $0x28] sm:$0x7]  ;;  %vm161_vm7 = vcmask 89088   ;;  %vm590_vm9 = vcmask 326656   ;;  %s4430_s4 = smov 96  }
  0x16   :  { %v26_v7 = vld [vmem:[%s5070_s0] sm:$0xff]  ;;  %v4085_v9 = vpack.c.bf16 %v151_v6, %v150_v5  ;;  %vm4472_vm6 = vmpackc.low %vm177_vm4, %vm4427_vm2  ;;  %v27_v11 = vld [vmem:[%s5070_s0 + $0x8] sm:$0xff]  ;;  %s4431_s5 = smov 32   ;;  %vm1414_vm11 = vcmask 261120   ;;  %s4432_s6 = smov [#allocation5]   ;;  %vm3377_vm12 = vcmask 261126  }
  0x17   :  { %4079 = vmatpush3.bf16.msk.msra.mxu0 %vm4078_vm3, %v4077_v4  ;;  %4239 = vmatpush3.bf16.msk.msra.mxu1 %vm4078_vm3, %v4077_v4  ;;  %v30_v8 = vld [vmem:[%s5070_s0 + $0x20] sm:$0xff]  ;;  %v28_v12 = vld [vmem:[%s5070_s0 + $0x10] sm:$0xff]  ;;  %v29_v13 = vld [vmem:[%s5070_s0 + $0x18] sm:$0xff]  ;;  %s4429_s0 = smov 64   ;;  %s3385_s7 = sshll.u32 %s4432_s6, 4  ;;  %s3386_s7 = int_to_ptr.vmem [resolvable:$true] %s3385_s7 }
  0x18   :  { %4084 = vmatprep.subr.bf16.mxu0 %v4424_v0  ;;  %4080 = vmatprep.subr.bf16.mxu1 %v4424_v0  ;;  %v148_v14 = vld [vmem:[#allocation2 + $0x10] sm:$0xff]  ;;  %v149_v15 = vld [vmem:[#allocation2 + $0x18] sm:$0x7]  ;;  %v33_v17 = vld [vmem:[#allocation2 + $0xa0] sm:$0xff]  ;;  %s4395_s8 = scalar_lea.vmem %s3386_s7, 32  ;;  %p4400_p9 = scmp.lt.s32.totalorder %s3386_s7, %s3386_s7 }
  0x19   :  { %v4081_v16 = vpack.c.bf16 %v149_v15, %v148_v14  ;;  %v152_v18 = vld [vmem:[#allocation2 + $0x30] sm:$0xff]  ;;  %v153_v19 = vld [vmem:[#allocation2 + $0x38] sm:$0x7]  ;;  %v34_v26 = vld [vmem:[#allocation2 + $0xa8] sm:$0xff]  ;;  %p4396_p8 = scmp.ne.s32.totalorder %s3386_s7, %s4395_s8  ;;  %p4401_p10 = scmp.lt.s32.totalorder %s4395_s8, %s4395_s8 }
  0x1a   :  { %3664 = vmatmul.mubr.msk.f32.vlgmr.msra.gmra.mrb[0].mxu0 %vm38_vm5, %v26_v7  ;;  %3676 = vmatmul.mubr.msk.f32.vlgmr.msra.gmra.mrb[0].mxu1 %vm38_vm5, %v30_v8  ;;  %v4089_v24 = vpack.c.bf16 %v153_v19, %v152_v18  ;;  %v35_v30 = vld [vmem:[#allocation2 + $0xb0] sm:$0xff]  ;;  %v36_v34 = vld [vmem:[#allocation2 + $0xb8] sm:$0xff]  ;;  %v37_v36 = vld [vmem:[#allocation2 + $0xc0] sm:$0xff] }
  0x1b   :  { %3666 = vmatprep.mubr.msk.f32.mxu0 %vm4425_vm0, %v4426_v1  ;;  %4087 = vmatpush3.bf16.msk.msra.mxu0 %vm4472_vm6, %v4085_v9  ;;  %v3407_v44 = vld [vmem:[#allocation2 + $0x91] ss:$0 sm:$0xff]  ;;  %vm4583_vm8 = vmpackc.low %vm161_vm7, %vm161_vm7  ;;  %v3414_v9 = vld [vmem:[#allocation2 + $0x92] ss:$0 sm:$0xff]  ;;  %p4402_p11 = por %p4401_p10, %p4400_p9 }
  0x1c   :  { %3682 = vmatprep.mubr.msk.f32.mxu1 %vm4425_vm0, %v4426_v1  ;;  %4092 = vmatprep.subr.bf16.mxu0 %v4424_v0  ;;  %v468_v51 = vld [vmem:[#allocation2 + $0xe0] sm:$0xff] }
  0x1d   :  { %4083 = vmatpush3.bf16.msk.msra.mxu1 %vm4472_vm6, %v4081_v16  ;;  %p4403_p12 = pnand %p4402_p11, %p4396_p8 }
  0x1e   :  { %3667 = vmatmul.mubr.msk.f32.gmra.mrb[2].mxu0 %vm38_vm5, %v27_v11  ;;  %4088 = vmatprep.subr.bf16.mxu1 %v4424_v0  ;;  %v3400_v11 = vld [vmem:[#allocation2 + $0x90] ss:$0 sm:$0xff] }
  0x1f   :  { %3669 = vmatprep.mubr.msk.f32.mxu0 %vm4425_vm0, %v4426_v1 }
  0x22   :  { %3670 = vmatmul.mubr.msk.f32.gmra.mrb[4].mxu0 %vm38_vm5, %v28_v12 }
  0x23   :  { %3672 = vmatprep.mubr.msk.f32.mxu0 %vm4425_vm0, %v4426_v1 }
  0x26   :  { %3673 = vmatmul.mubr.msk.f32.gmra.mrb[6].mxu0 %vm38_vm5, %v29_v13 }
  0x27   :  { %3701 = vmatprep.mubr.msk.f32.mxu0 %vm4425_vm0, %v4426_v1 }
  0xed   :  { %v124_v20 = vpop.f32.mrb[0].mxu0  ;;  %v144_v21 = vpop.f32.mrb[0].mxu1 }
  0xee   :  { %v4508_v22 = vadd.f32 %v124_v20, %v33_v17  ;;  %v3665_v23 = vpop.f32.mrb[1].mxu0  ;;  %v3677_v25 = vpop.f32.mrb[1].mxu1  ;;  %v4547_v39 = vadd.f32 %v144_v21, %v37_v36 }
  0xf0   :  { %3683 = vmatmul.mubr.msk.f32.vlgmr.msra.gmra.mrb[2].mxu1 %vm161_vm7, %v4508_v22  ;;  %3702 = vmatmul.mubr.msk.f32.vlgmr.msra.gmra.mrb[8].mxu0 %vm161_vm7, %v4508_v22 }
  0xf1   :  { %v129_v27 = vpop.f32.mrb[2].mxu0  ;;  %3685 = vmatprep.mubr.msk.f32.mxu1 %vm4425_vm0, %v4426_v1  ;;  %3704 = vmatprep.mubr.msk.f32.mxu0 %vm4425_vm0, %v4426_v1 }
  0xf2   :  { %v4518_v28 = vadd.f32 %v129_v27, %v34_v26  ;;  %v3668_v29 = vpop.f32.mrb[3].mxu0  ;;  %4091 = vmatpush3.bf16.msk.msra.mxu1 %vm4472_vm6, %v4089_v24 }
  0xf3   :  { %4100 = vmatprep.subr.bf16.mxu1 %v4424_v0 }
  0xf4   :  { %3686 = vmatmul.mubr.msk.f32.gmra.mrb[4].mxu1 %vm161_vm7, %v4518_v28  ;;  %3705 = vmatmul.mubr.msk.f32.gmra.mrb[10].mxu0 %vm161_vm7, %v4518_v28 }
  0xf5   :  { %v134_v31 = vpop.f32.mrb[4].mxu0  ;;  %3688 = vmatprep.mubr.msk.f32.mxu1 %vm4425_vm0, %v4426_v1  ;;  %3707 = vmatprep.mubr.msk.f32.mxu0 %vm4425_vm0, %v4426_v1 }
  0xf6   :  { %v4531_v32 = vadd.f32 %v134_v31, %v35_v30  ;;  %v3671_v33 = vpop.f32.mrb[5].mxu0 }
  0xf8   :  { %3689 = vmatmul.mubr.msk.f32.gmra.mrb[6].mxu1 %vm161_vm7, %v4531_v32  ;;  %3708 = vmatmul.mubr.msk.f32.gmra.mrb[12].mxu0 %vm161_vm7, %v4531_v32 }
  0xf9   :  { %v139_v35 = vpop.f32.mrb[6].mxu0  ;;  %3691 = vmatprep.mubr.msk.f32.mxu1 %vm4425_vm0, %v4426_v1  ;;  %3710 = vmatprep.mubr.msk.f32.mxu0 %vm4425_vm0, %v4426_v1 }
  0xfa   :  { %v4541_v37 = vadd.f32 %v139_v35, %v36_v34  ;;  %v3674_v38 = vpop.f32.mrb[7].mxu0  ;;  %v465_v35 = vld [vmem:[#allocation2 + $0xc8] sm:$0xff] }
  0xfc   :  { %3692 = vmatmul.mubr.msk.f32.gmra.mrb[8].mxu1 %vm161_vm7, %v4541_v37  ;;  %3711 = vmatmul.mubr.msk.f32.gmra.mrb[14].mxu0 %vm161_vm7, %v4541_v37 }
  0xfd   :  { %3694 = vmatprep.mubr.msk.f32.mxu1 %vm4425_vm0, %v4426_v1  ;;  %3713 = vmatprep.mubr.msk.f32.mxu0 %vm4425_vm0, %v4426_v1 }
 0x100   :  { %3695 = vmatmul.mubr.msk.f32.gmra.mrb[10].mxu1 %vm161_vm7, %v4547_v39  ;;  %3714 = vmatmul.mubr.msk.f32.gmra.mrb[16].mxu0 %vm161_vm7, %v4547_v39 }
 0x101   :  { %3720 = vmatprep.mubr.msk.f32.mxu1 %vm4425_vm0, %v4426_v1  ;;  %3745 = vmatprep.mubr.msk.f32.mxu0 %vm4425_vm0, %v4426_v1 }
 0x104   :  { %3721 = vmatmul.mubr.msk.f32.vlgmr.msra.gmra.mrb[12].mxu1 %vm161_vm7, %v4508_v22 }
 0x105   :  { %3723 = vmatprep.mubr.msk.f32.mxu1 %vm4425_vm0, %v4426_v1 }
 0x108   :  { %3724 = vmatmul.mubr.msk.f32.gmra.mrb[14].mxu1 %vm161_vm7, %v4518_v28 }
 0x109   :  { %3726 = vmatprep.mubr.msk.f32.mxu1 %vm4425_vm0, %v4426_v1 }
 0x10c   :  { %3727 = vmatmul.mubr.msk.f32.gmra.mrb[16].mxu1 %vm161_vm7, %v4531_v32 }
 0x10d   :  { %3729 = vmatprep.mubr.msk.f32.mxu1 %vm4425_vm0, %v4426_v1 }
 0x110   :  { %3730 = vmatmul.mubr.msk.f32.gmra.mrb[18].mxu1 %vm161_vm7, %v4541_v37 }
 0x111   :  { %3732 = vmatprep.mubr.msk.f32.mxu1 %vm4425_vm0, %v4426_v1 }
 0x114   :  { %3733 = vmatmul.mubr.msk.f32.gmra.mrb[20].mxu1 %vm161_vm7, %v4547_v39 }
 0x115   :  { %3770 = vmatprep.mubr.msk.f32.mxu1 %vm4425_vm0, %v4426_v1 }
 0x1c3   :  { %v247_v40 = vpop.f32.mrb[2].mxu1  ;;  %v344_v41 = vpop.f32.mrb[8].mxu0 }
 0x1c4   :  { %v3684_v42 = vpop.f32.mrb[3].mxu1  ;;  %v3703_v43 = vpop.f32.mrb[9].mxu0  ;;  %v345_v47 = vadd.f32 %v3407_v44, %v344_v41  ;;  %v248_v16 = vadd.f32 %v3400_v11, %v247_v40  ;;  %v466_v41 = vld [vmem:[#allocation2 + $0xd0] sm:$0xff] }
 0x1c7   :  { %v252_v45 = vpop.f32.mrb[4].mxu1  ;;  %v349_v46 = vpop.f32.mrb[10].mxu0 }
 0x1c8   :  { %v350_v48 = vadd.f32 %v3407_v44, %v349_v46  ;;  %v3687_v49 = vpop.f32.mrb[5].mxu1  ;;  %v3706_v50 = vpop.f32.mrb[11].mxu0  ;;  %v253_v20 = vadd.f32 %v3400_v11, %v252_v45  ;;  %v467_v46 = vld [vmem:[#allocation2 + $0xd8] sm:$0xff] }
 0x1ca   :  { %v4093_v52 = vpack.c.bf16 %v350_v48, %v345_v47 }
 0x1cb   :  { %v257_v53 = vpop.f32.mrb[6].mxu1  ;;  %v354_v54 = vpop.f32.mrb[12].mxu0 }
 0x1cc   :  { %v3690_v55 = vpop.f32.mrb[7].mxu1  ;;  %v3709_v56 = vpop.f32.mrb[13].mxu0  ;;  %4095 = vmatpush3.bf16.xpose.msk.msra.mxu0 %vm4583_vm8, %v4093_v52  ;;  %v355_v59 = vadd.f32 %v3407_v44, %v354_v54  ;;  %v258_v26 = vadd.f32 %v3400_v11, %v257_v53 }
 0x1cd   :  { %4096 = vmatprep.subr.bf16.mxu0 %v4424_v0  ;;  %v469_v56 = vld [vmem:[#allocation2 + $0xe8] sm:$0xff] }
 0x1cf   :  { %v262_v57 = vpop.f32.mrb[8].mxu1  ;;  %v359_v58 = vpop.f32.mrb[14].mxu0 }
 0x1d0   :  { %v360_v60 = vadd.f32 %v3407_v44, %v359_v58  ;;  %v3693_v61 = vpop.f32.mrb[9].mxu1  ;;  %v3712_v62 = vpop.f32.mrb[15].mxu0  ;;  %v263_v31 = vadd.f32 %v3400_v11, %v262_v57 }
 0x1d2   :  { %v4097_v63 = vpack.c.bf16 %v360_v60, %v355_v59 }
 0x1d3   :  { %v267_v2 = vpop.f32.mrb[10].mxu1  ;;  %v364_v3 = vpop.f32.mrb[16].mxu0 }
 0x1d4   :  { %4099 = vmatpush3.bf16.xpose.msk.msra.mxu0 %vm4583_vm8, %v4097_v63  ;;  %v3696_v4 = vpop.f32.mrb[11].mxu1  ;;  %v3715_v5 = vpop.f32.mrb[17].mxu0  ;;  %v365_v7 = vadd.f32 %v3407_v44, %v364_v3  ;;  %v268_v34 = vadd.f32 %v3400_v11, %v267_v2 }
 0x1d5   :  { %3743 = vmatprep.subr.mxu0 %v4426_v1 }
 0x1d7   :  { %v441_v6 = vpop.f32.mrb[12].mxu1 }
 0x1d8   :  { %v3722_v8 = vpop.f32.mrb[13].mxu1  ;;  %v442_v13 = vadd.f32 %v3414_v9, %v441_v6 }
 0x1db   :  { %v446_v12 = vpop.f32.mrb[14].mxu1 }
 0x1dc   :  { %v447_v14 = vadd.f32 %v3414_v9, %v446_v12  ;;  %v3725_v15 = vpop.f32.mrb[15].mxu1  ;;  %3744 = vmatpush3.xpose.msk.msra.mxu0 %vm161_vm7, %v365_v7 }
 0x1dd   :  { %4106 = vmatprep.subr.bf16.mxu0 %v4424_v0 }
 0x1de   :  { %v4101_v17 = vpack.c.bf16 %v447_v14, %v442_v13 }
 0x1df   :  { %v451_v18 = vpop.f32.mrb[16].mxu1  ;;  %3746 = vmatmul.mubr.msk.f32.vlgmr.msra.gmra.mrb[18].mxu0 %vm161_vm7, %v248_v16 }
 0x1e0   :  { %v3728_v19 = vpop.f32.mrb[17].mxu1  ;;  %4102 = vmatpush3.bf16.msra.mxu1 %v4101_v17  ;;  %3748 = vmatprep.mubr.msk.f32.mxu0 %vm4425_vm0, %v4426_v1  ;;  %v452_v23 = vadd.f32 %v3414_v9, %v451_v18 }
 0x1e1   :  { %4103 = vmatprep.subr.bf16.mxu1 %v4424_v0 }
 0x1e3   :  { %v456_v21 = vpop.f32.mrb[18].mxu1  ;;  %3749 = vmatmul.mubr.msk.f32.gmra.mrb[20].mxu0 %vm161_vm7, %v253_v20 }
 0x1e4   :  { %v457_v24 = vadd.f32 %v3414_v9, %v456_v21  ;;  %v3731_v25 = vpop.f32.mrb[19].mxu1  ;;  %3751 = vmatprep.mubr.msk.f32.mxu0 %vm4425_vm0, %v4426_v1 }
 0x1e6   :  { %v4104_v27 = vpack.c.bf16 %v457_v24, %v452_v23 }
 0x1e7   :  { %v461_v29 = vpop.f32.mrb[20].mxu1  ;;  %3752 = vmatmul.mubr.msk.f32.gmra.mrb[22].mxu0 %vm161_vm7, %v258_v26 }
 0x1e8   :  { %v3734_v30 = vpop.f32.mrb[21].mxu1  ;;  %4105 = vmatpush3.bf16.msra.mxu1 %v4104_v27  ;;  %3754 = vmatprep.mubr.msk.f32.mxu0 %vm4425_vm0, %v4426_v1  ;;  %v462_v33 = vadd.f32 %v3414_v9, %v461_v29  ;;  %v751_v27 = vld [vmem:[#allocation2 + $0x40] sm:$0xff]  ;;  %v752_v29 = vld [vmem:[#allocation2 + $0x48] sm:$0x7] }
 0x1e9   :  { %3768 = vmatprep.subr.mxu1 %v4426_v1  ;;  %v4107_v30 = vpack.c.bf16 %v752_v29, %v751_v27 }
 0x1eb   :  { %3755 = vmatmul.mubr.msk.f32.gmra.mrb[24].mxu0 %vm161_vm7, %v263_v31 }
 0x1ec   :  { %3769 = vmatpush3.msra.mxu1 %v462_v33  ;;  %3757 = vmatprep.mubr.msk.f32.mxu0 %vm4425_vm0, %v4426_v1 }
 0x1ed   :  { %4110 = vmatprep.subr.bf16.mxu1 %v4424_v0  ;;  %4109 = vmatpush3.bf16.msk.msra.mxu0 %vm4472_vm6, %v4107_v30 }
 0x1ee   :  { %4114 = vmatprep.subr.bf16.mxu0 %v4424_v0 }
 0x1ef   :  { %3758 = vmatmul.mubr.msk.f32.gmra.mrb[26].mxu0 %vm161_vm7, %v268_v34 }
 0x1f0   :  { %3789 = vmatprep.mubr.msk.f32.mxu0 %vm4425_vm0, %v4426_v1 }
 0x2b2   :  { %v566_v36 = vpop.f32.mrb[18].mxu0 }
 0x2b3   :  { %v567_v38 = vadd.f32 %v566_v36, %v465_v35  ;;  %v3747_v40 = vpop.f32.mrb[19].mxu0 }
 0x2b5   :  { %v591_v42 = vsel %vm590_vm9, %v567_v38, -inf }
 0x2b6   :  { %592 = vmax.xlane.f32.xlu0 %v591_v42  ;;  %v571_v43 = vpop.f32.mrb[20].mxu0 }
 0x2b7   :  { %v572_v44 = vadd.f32 %v571_v43, %v466_v41  ;;  %v3750_v45 = vpop.f32.mrb[21].mxu0 }
 0x2b9   :  { %v594_v47 = vsel %vm590_vm9, %v572_v44, -inf }
 0x2ba   :  { %595 = vmax.xlane.f32.xlu0 %v594_v47  ;;  %v576_v48 = vpop.f32.mrb[22].mxu0 }
 0x2bb   :  { %v577_v49 = vadd.f32 %v576_v48, %v467_v46  ;;  %v3753_v50 = vpop.f32.mrb[23].mxu0 }
 0x2bd   :  { %v597_v52 = vsel %vm590_vm9, %v577_v49, -inf }
 0x2be   :  { %598 = vmax.xlane.f32.xlu1 %v597_v52  ;;  %v581_v53 = vpop.f32.mrb[24].mxu0 }
 0x2bf   :  { %v582_v54 = vadd.f32 %v581_v53, %v468_v51  ;;  %v3756_v55 = vpop.f32.mrb[25].mxu0 }
 0x2c1   :  { %v600_v57 = vsel %vm590_vm9, %v582_v54, -inf }
 0x2c2   :  { %601 = vmax.xlane.f32.xlu1 %v600_v57  ;;  %v586_v58 = vpop.f32.mrb[26].mxu0 }
 0x2c3   :  { %v587_v59 = vadd.f32 %v586_v58, %v469_v56  ;;  %v3759_v60 = vpop.f32.mrb[27].mxu0 }
 0x2c5   :  { %v603_v61 = vsel %vm590_vm9, %v587_v59, -inf }
 0x2c6   :  { %604 = vmax.xlane.f32.xlu0 %v603_v61 }
 0x343   :  { %v593_v62 = vpop.xlane.xlu0 %592 }
 0x344   :  { %v606_v63 = vsub.f32 %v567_v38, %v593_v62 }
 0x346   :  { %v611_v2 = vmul.f32 1.442695, %v606_v63 }
 0x347   :  { %v596_v3 = vpop.xlane.xlu0 %595 }
 0x348   :  { %4252 = vpow2.f32 %v611_v2  ;;  %v607_v4 = vsub.f32 %v572_v44, %v596_v3 }
 0x34a   :  { %v613_v5 = vmul.f32 1.442695, %v607_v4 }
 0x34b   :  { %v599_v6 = vpop.xlane.xlu1 %598 }
 0x34c   :  { %4254 = vpow2.f32 %v613_v5  ;;  %v608_v7 = vsub.f32 %v577_v49, %v599_v6 }
 0x34e   :  { %v615_v8 = vmul.f32 1.442695, %v608_v7 }
 0x34f   :  { %v602_v9 = vpop.xlane.xlu1 %601 }
 0x350   :  { %4256 = vpow2.f32 %v615_v8  ;;  %v609_v11 = vsub.f32 %v582_v54, %v602_v9 }
 0x352   :  { %v4253_v12 = vpop.eup %4252  ;;  %v617_v13 = vmul.f32 1.442695, %v609_v11 }
 0x353   :  { %v605_v14 = vpop.xlane.xlu0 %604  ;;  %v621_v15 = vsel %vm590_vm9, %v4253_v12, 0.0 }
 0x354   :  { %4258 = vpow2.f32 %v617_v13  ;;  %v610_v16 = vsub.f32 %v587_v59, %v605_v14  ;;  %622 = vadd.xlane.f32.xlu1 %v621_v15  ;;  %v3436_v59 = vld [vmem:[#allocation2 + $0x93] ss:$0 sm:$0xff] }
 0x356   :  { %v4255_v17 = vpop.eup %4254  ;;  %v619_v18 = vmul.f32 1.442695, %v610_v16 }
 0x357   :  { %v624_v19 = vsel %vm590_vm9, %v4255_v17, 0.0 }
 0x358   :  { %4260 = vpow2.f32 %v619_v18  ;;  %625 = vadd.xlane.f32.xlu0 %v624_v19 }
 0x35a   :  { %v4257_v20 = vpop.eup %4256 }
 0x35b   :  { %v627_v21 = vsel %vm590_vm9, %v4257_v20, 0.0 }
 0x35c   :  { %628 = vadd.xlane.f32.xlu1 %v627_v21 }
 0x35e   :  { %v4259_v23 = vpop.eup %4258 }
 0x35f   :  { %v630_v24 = vsel %vm590_vm9, %v4259_v23, 0.0 }
 0x360   :  { %631 = vadd.xlane.f32.xlu0 %v630_v24 }
 0x362   :  { %v4261_v25 = vpop.eup %4260 }
 0x363   :  { %v633_v26 = vsel %vm590_vm9, %v4261_v25, 0.0 }
 0x364   :  { %634 = vadd.xlane.f32.xlu1 %v633_v26 }
 0x3e1   :  { %v623_v31 = vpop.xlane.xlu1 %622 }
 0x3e2   :  { %4262 = vrcp.f32 %v623_v31 }
 0x3e5   :  { %v626_v33 = vpop.xlane.xlu0 %625 }
 0x3e6   :  { %4264 = vrcp.f32 %v626_v33 }
 0x3e9   :  { %v629_v34 = vpop.xlane.xlu1 %628 }
 0x3ea   :  { %4266 = vrcp.f32 %v629_v34 }
 0x3ec   :  { %v4263_v35 = vpop.eup %4262 }
 0x3ed   :  { %v637_v36 = vmul.f32 %v4263_v35, %v4253_v12  ;;  %v632_v38 = vpop.xlane.xlu0 %631 }
 0x3ee   :  { %4268 = vrcp.f32 %v632_v38 }
 0x3ef   :  { %3771 = vmatmul.mubr.msk.f32.vlgmr.msra.gmra.mrb[22].mxu1 %vm590_vm9, %v637_v36 }
 0x3f0   :  { %v4265_v40 = vpop.eup %4264  ;;  %3773 = vmatprep.mubr.msk.f32.mxu1 %vm4425_vm0, %v4426_v1 }
 0x3f1   :  { %v635_v41 = vpop.xlane.xlu1 %634  ;;  %v639_v42 = vmul.f32 %v4265_v40, %v4255_v17 }
 0x3f2   :  { %4270 = vrcp.f32 %v635_v41 }
 0x3f3   :  { %3774 = vmatmul.mubr.msk.f32.gmra.mrb[24].mxu1 %vm590_vm9, %v639_v42 }
 0x3f4   :  { %v4267_v43 = vpop.eup %4266  ;;  %3776 = vmatprep.mubr.msk.f32.mxu1 %vm4425_vm0, %v4426_v1 }
 0x3f5   :  { %v641_v44 = vmul.f32 %v4267_v43, %v4257_v20 }
 0x3f7   :  { %3777 = vmatmul.mubr.msk.f32.gmra.mrb[26].mxu1 %vm590_vm9, %v641_v44 }
 0x3f8   :  { %v4269_v45 = vpop.eup %4268  ;;  %3779 = vmatprep.mubr.msk.f32.mxu1 %vm4425_vm0, %v4426_v1 }
 0x3f9   :  { %v643_v46 = vmul.f32 %v4269_v45, %v4259_v23 }
 0x3fb   :  { %3780 = vmatmul.mubr.msk.f32.gmra.mrb[28].mxu1 %vm590_vm9, %v643_v46 }
 0x3fc   :  { %v4271_v47 = vpop.eup %4270  ;;  %3782 = vmatprep.mubr.msk.f32.mxu1 %vm4425_vm0, %v4426_v1 }
 0x3fd   :  { %v645_v48 = vmul.f32 %v4271_v47, %v4261_v25 }
 0x3ff   :  { %3783 = vmatmul.mubr.msk.f32.gmra.mrb[30].mxu1 %vm590_vm9, %v645_v48 }
 0x400   :  { %3808 = vmatprep.mubr.msk.f32.mxu1 %vm4425_vm0, %v4426_v1 }
 0x4c2   :  { %v727_v49 = vpop.f32.mrb[22].mxu1 }
 0x4c3   :  { %v3772_v50 = vpop.f32.mrb[23].mxu1  ;;  %3790 = vmatmul.mubr.msk.f32.vlgmr.msra.gmra.mrb[28].mxu0 %vm161_vm7, %v727_v49  ;;  %v870_v49 = vld [vmem:[#allocation2 + $0x50] sm:$0xff] }
 0x4c4   :  { %3792 = vmatprep.mubr.msk.f32.mxu0 %vm4425_vm0, %v4426_v1  ;;  %v871_v50 = vld [vmem:[#allocation2 + $0x58] sm:$0x7] }
 0x4c6   :  { %v732_v51 = vpop.f32.mrb[24].mxu1 }
 0x4c7   :  { %v3775_v52 = vpop.f32.mrb[25].mxu1  ;;  %3793 = vmatmul.mubr.msk.f32.gmra.mrb[30].mxu0 %vm161_vm7, %v732_v51  ;;  %v4111_v51 = vpack.c.bf16 %v871_v50, %v870_v49 }
 0x4c8   :  { %3795 = vmatprep.mubr.msk.f32.mxu0 %vm4425_vm0, %v4426_v1 }
 0x4c9   :  { %4113 = vmatpush3.bf16.msk.msra.mxu1 %vm4472_vm6, %v4111_v51 }
 0x4ca   :  { %v737_v53 = vpop.f32.mrb[26].mxu1  ;;  %4120 = vmatprep.subr.bf16.mxu1 %v4424_v0 }
 0x4cb   :  { %v3778_v54 = vpop.f32.mrb[27].mxu1  ;;  %3796 = vmatmul.mubr.msk.f32.gmra.mrb[32].mxu0 %vm161_vm7, %v737_v53 }
 0x4cc   :  { %3798 = vmatprep.mubr.msk.f32.mxu0 %vm4425_vm0, %v4426_v1 }
 0x4ce   :  { %v742_v55 = vpop.f32.mrb[28].mxu1 }
 0x4cf   :  { %v3781_v56 = vpop.f32.mrb[29].mxu1  ;;  %3799 = vmatmul.mubr.msk.f32.gmra.mrb[34].mxu0 %vm161_vm7, %v742_v55 }
 0x4d0   :  { %3801 = vmatprep.mubr.msk.f32.mxu0 %vm4425_vm0, %v4426_v1 }
 0x4d2   :  { %v747_v57 = vpop.f32.mrb[30].mxu1 }
 0x4d3   :  { %v3784_v58 = vpop.f32.mrb[31].mxu1  ;;  %3802 = vmatmul.mubr.msk.f32.gmra.mrb[36].mxu0 %vm161_vm7, %v747_v57 }
 0x4d4   :  { %3833 = vmatprep.mubr.msk.f32.mxu0 %vm4425_vm0, %v4426_v1 }
 0x596   :  { %v842_v60 = vpop.f32.mrb[28].mxu0 }
 0x597   :  { %v843_v61 = vadd.f32 %v3436_v59, %v842_v60  ;;  %v3791_v62 = vpop.f32.mrb[29].mxu0 }
 0x599   :  { %v873_v63 = vadd.f32 %v843_v61, %v4508_v22 }
 0x59a   :  { %v847_v2 = vpop.f32.mrb[30].mxu0 }
 0x59b   :  { %v848_v3 = vadd.f32 %v3436_v59, %v847_v2  ;;  %v3794_v4 = vpop.f32.mrb[31].mxu0  ;;  %v878_v5 = vsel %vm161_vm7, %v873_v63, 0.0  ;;  %v3443_v2 = vld [vmem:[#allocation2 + $0x95] ss:$0 sm:$0xff] }
 0x59c   :  { %879 = vadd.xlane.f32.xlu0 %v878_v5 }
 0x59d   :  { %v874_v6 = vadd.f32 %v848_v3, %v4518_v28 }
 0x59e   :  { %v852_v7 = vpop.f32.mrb[32].mxu0 }
 0x59f   :  { %v853_v8 = vadd.f32 %v3436_v59, %v852_v7  ;;  %v3797_v9 = vpop.f32.mrb[33].mxu0  ;;  %v881_v11 = vsel %vm161_vm7, %v874_v6, 0.0 }
 0x5a0   :  { %882 = vadd.xlane.f32.xlu1 %v881_v11 }
 0x5a1   :  { %v875_v12 = vadd.f32 %v853_v8, %v4531_v32 }
 0x5a2   :  { %v857_v13 = vpop.f32.mrb[34].mxu0 }
 0x5a3   :  { %v858_v14 = vadd.f32 %v3436_v59, %v857_v13  ;;  %v3800_v15 = vpop.f32.mrb[35].mxu0  ;;  %v884_v22 = vsel %vm161_vm7, %v875_v12, 0.0 }
 0x5a4   :  { %885 = vadd.xlane.f32.xlu0 %v884_v22 }
 0x5a5   :  { %v876_v16 = vadd.f32 %v858_v14, %v4541_v37 }
 0x5a6   :  { %v862_v17 = vpop.f32.mrb[36].mxu0 }
 0x5a7   :  { %v863_v18 = vadd.f32 %v3436_v59, %v862_v17  ;;  %v3803_v19 = vpop.f32.mrb[37].mxu0  ;;  %v887_v28 = vsel %vm161_vm7, %v876_v16, 0.0 }
 0x5a8   :  { %888 = vadd.xlane.f32.xlu1 %v887_v28 }
 0x5a9   :  { %v877_v20 = vadd.f32 %v863_v18, %v4547_v39 }
 0x5ab   :  { %v890_v21 = vsel %vm161_vm7, %v877_v20, 0.0 }
 0x5ac   :  { %891 = vadd.xlane.f32.xlu0 %v890_v21 }
 0x629   :  { %v880_v32 = vpop.xlane.xlu0 %879 }
 0x62a   :  { %v894_v23 = vmul.f32 0.09090909, %v880_v32 }
 0x62c   :  { %v899_v24 = vsub.f32 %v873_v63, %v894_v23 }
 0x62d   :  { %v883_v25 = vpop.xlane.xlu1 %882 }
 0x62e   :  { %v895_v26 = vmul.f32 0.09090909, %v883_v25  ;;  %v904_v27 = vmul.f32 %v899_v24, %v899_v24 }
 0x630   :  { %v900_v29 = vsub.f32 %v874_v6, %v895_v26  ;;  %v909_v37 = vsel %vm161_vm7, %v904_v27, 0.0  ;;  %v3444_v6 = vld [vmem:[#allocation2 + $0x96] ss:$0 sm:$0xff]  ;;  %v3445_v26 = vld [vmem:[#allocation2 + $0x94] ss:$0 sm:$0xff] }
 0x631   :  { %v886_v30 = vpop.xlane.xlu0 %885  ;;  %910 = vadd.xlane.f32.xlu1 %v909_v37 }
 0x632   :  { %v896_v31 = vmul.f32 0.09090909, %v886_v30  ;;  %v905_v33 = vmul.f32 %v900_v29, %v900_v29 }
 0x634   :  { %v901_v34 = vsub.f32 %v875_v12, %v896_v31  ;;  %v912_v35 = vsel %vm161_vm7, %v905_v33, 0.0 }
 0x635   :  { %v889_v39 = vpop.xlane.xlu1 %888  ;;  %913 = vadd.xlane.f32.xlu0 %v912_v35 }
 0x636   :  { %v897_v36 = vmul.f32 0.09090909, %v889_v39  ;;  %v906_v38 = vmul.f32 %v901_v34, %v901_v34 }
 0x638   :  { %v902_v40 = vsub.f32 %v876_v16, %v897_v36  ;;  %v915_v41 = vsel %vm161_vm7, %v906_v38, 0.0 }
 0x639   :  { %916 = vadd.xlane.f32.xlu1 %v915_v41  ;;  %v892_v42 = vpop.xlane.xlu0 %891 }
 0x63a   :  { %v898_v43 = vmul.f32 0.09090909, %v892_v42  ;;  %v907_v44 = vmul.f32 %v902_v40, %v902_v40 }
 0x63c   :  { %v903_v45 = vsub.f32 %v877_v20, %v898_v43  ;;  %v918_v46 = vsel %vm161_vm7, %v907_v44, 0.0 }
 0x63d   :  { %919 = vadd.xlane.f32.xlu0 %v918_v46 }
 0x63e   :  { %v908_v47 = vmul.f32 %v903_v45, %v903_v45 }
 0x640   :  { %v921_v48 = vsel %vm161_vm7, %v908_v47, 0.0 }
 0x641   :  { %922 = vadd.xlane.f32.xlu1 %v921_v48 }
 0x6be   :  { %v911_v52 = vpop.xlane.xlu1 %910 }
 0x6bf   :  { %v924_v53 = vmul.f32 0.09090909, %v911_v52 }
 0x6c1   :  { %v929_v54 = vadd.f32 1e-05, %v924_v53 }
 0x6c2   :  { %v914_v55 = vpop.xlane.xlu0 %913 }
 0x6c3   :  { %4272 = vrsqrt.f32 %v929_v54  ;;  %v925_v56 = vmul.f32 0.09090909, %v914_v55 }
 0x6c5   :  { %v930_v57 = vadd.f32 1e-05, %v925_v56 }
 0x6c6   :  { %v917_v58 = vpop.xlane.xlu1 %916 }
 0x6c7   :  { %4274 = vrsqrt.f32 %v930_v57  ;;  %v926_v59 = vmul.f32 0.09090909, %v917_v58 }
 0x6c9   :  { %v931_v60 = vadd.f32 1e-05, %v926_v59 }
 0x6ca   :  { %v920_v61 = vpop.xlane.xlu0 %919 }
 0x6cb   :  { %4276 = vrsqrt.f32 %v931_v60  ;;  %v927_v62 = vmul.f32 0.09090909, %v920_v61 }
 0x6cd   :  { %v4273_v63 = vpop.eup %4272  ;;  %v932_v3 = vadd.f32 1e-05, %v927_v62 }
 0x6ce   :  { %v939_v4 = vmul.f32 %v4273_v63, %v899_v24  ;;  %v923_v5 = vpop.xlane.xlu1 %922 }
 0x6cf   :  { %4278 = vrsqrt.f32 %v932_v3  ;;  %v928_v7 = vmul.f32 0.09090909, %v923_v5 }
 0x6d0   :  { %v948_v8 = vmul.f32 %v3443_v2, %v939_v4 }
 0x6d1   :  { %v4275_v9 = vpop.eup %4274  ;;  %v933_v11 = vadd.f32 1e-05, %v928_v7 }
 0x6d2   :  { %v957_v12 = vadd.f32 %v3444_v6, %v948_v8  ;;  %v940_v13 = vmul.f32 %v4275_v9, %v900_v29 }
 0x6d3   :  { %4280 = vrsqrt.f32 %v933_v11 }
 0x6d4   :  { %3809 = vmatmul.mubr.msk.f32.vlgmr.msra.gmra.mrb[32].mxu1 %vm161_vm7, %v957_v12  ;;  %v949_v14 = vmul.f32 %v3443_v2, %v940_v13 }
 0x6d5   :  { %v4277_v15 = vpop.eup %4276  ;;  %3811 = vmatprep.mubr.msk.f32.mxu1 %vm4425_vm0, %v4426_v1 }
 0x6d6   :  { %v958_v22 = vadd.f32 %v3444_v6, %v949_v14  ;;  %v941_v16 = vmul.f32 %v4277_v15, %v901_v34 }
 0x6d8   :  { %3812 = vmatmul.mubr.msk.f32.gmra.mrb[34].mxu1 %vm161_vm7, %v958_v22  ;;  %v950_v17 = vmul.f32 %v3443_v2, %v941_v16 }
 0x6d9   :  { %v4279_v18 = vpop.eup %4278  ;;  %3814 = vmatprep.mubr.msk.f32.mxu1 %vm4425_vm0, %v4426_v1 }
 0x6da   :  { %v959_v19 = vadd.f32 %v3444_v6, %v950_v17  ;;  %v942_v28 = vmul.f32 %v4279_v18, %v902_v40  ;;  %v1272_v17 = vld [vmem:[#allocation2 + $0x60] sm:$0xff]  ;;  %v1273_v18 = vld [vmem:[#allocation2 + $0x68] sm:$0x7] }
 0x6dc   :  { %3815 = vmatmul.mubr.msk.f32.gmra.mrb[36].mxu1 %vm161_vm7, %v959_v19  ;;  %v951_v20 = vmul.f32 %v3443_v2, %v942_v28 }
 0x6dd   :  { %v4281_v21 = vpop.eup %4280  ;;  %3817 = vmatprep.mubr.msk.f32.mxu1 %vm4425_vm0, %v4426_v1 }
 0x6de   :  { %v960_v32 = vadd.f32 %v3444_v6, %v951_v20  ;;  %v943_v23 = vmul.f32 %v4281_v21, %v903_v45 }
 0x6e0   :  { %3818 = vmatmul.mubr.msk.f32.gmra.mrb[38].mxu1 %vm161_vm7, %v960_v32  ;;  %v952_v24 = vmul.f32 %v3443_v2, %v943_v23 }
 0x6e1   :  { %3820 = vmatprep.mubr.msk.f32.mxu1 %vm4425_vm0, %v4426_v1 }
 0x6e2   :  { %v961_v25 = vadd.f32 %v3444_v6, %v952_v24 }
 0x6e4   :  { %3821 = vmatmul.mubr.msk.f32.gmra.mrb[40].mxu1 %vm161_vm7, %v961_v25 }
 0x6e5   :  { %3852 = vmatprep.mubr.msk.f32.mxu1 %vm4425_vm0, %v4426_v1 }
 0x7a7   :  { %v1050_v27 = vpop.f32.mrb[32].mxu1 }
 0x7a8   :  { %v1051_v29 = vadd.f32 %v3445_v26, %v1050_v27  ;;  %v3810_v37 = vpop.f32.mrb[33].mxu1 }
 0x7aa   :  { %v1074_v30 = vadd.f32 %v1051_v29, %v957_v12 }
 0x7ab   :  { %v1055_v31 = vpop.f32.mrb[34].mxu1 }
 0x7ac   :  { %v1056_v33 = vadd.f32 %v3445_v26, %v1055_v31  ;;  %v3813_v34 = vpop.f32.mrb[35].mxu1  ;;  %v1079_v35 = vsel %vm161_vm7, %v1074_v30, 0.0 }
 0x7ad   :  { %1080 = vadd.xlane.f32.xlu0 %v1079_v35  ;;  %v3452_v35 = vld [vmem:[#allocation2 + $0x97] ss:$0 sm:$0xff] }
 0x7ae   :  { %v1075_v39 = vadd.f32 %v1056_v33, %v958_v22 }
 0x7af   :  { %v1060_v36 = vpop.f32.mrb[36].mxu1 }
 0x7b0   :  { %v1061_v38 = vadd.f32 %v3445_v26, %v1060_v36  ;;  %v3816_v40 = vpop.f32.mrb[37].mxu1  ;;  %v1082_v41 = vsel %vm161_vm7, %v1075_v39, 0.0 }
 0x7b1   :  { %1083 = vadd.xlane.f32.xlu1 %v1082_v41  ;;  %v3453_v41 = vld [vmem:[#allocation2 + $0x98] ss:$0 sm:$0xff] }
 0x7b2   :  { %v1076_v42 = vadd.f32 %v1061_v38, %v959_v19  ;;  %v4121_v19 = vpack.c.bf16 %v1273_v18, %v1272_v17  ;;  %v1274_v17 = vld [vmem:[#allocation2 + $0x70] sm:$0xff]  ;;  %v1275_v18 = vld [vmem:[#allocation2 + $0x78] sm:$0xff] }
 0x7b3   :  { %v1065_v43 = vpop.f32.mrb[38].mxu1 }
 0x7b4   :  { %v1066_v44 = vadd.f32 %v3445_v26, %v1065_v43  ;;  %v3819_v45 = vpop.f32.mrb[39].mxu1  ;;  %v1085_v46 = vsel %vm161_vm7, %v1076_v42, 0.0  ;;  %4123 = vmatpush3.bf16.msk.msra.mxu1 %vm4472_vm6, %v4121_v19  ;;  %v1164_v19 = vld [vmem:[#allocation2 + $0x100] sm:$0xff] }
 0x7b5   :  { %1086 = vadd.xlane.f32.xlu0 %v1085_v46  ;;  %4130 = vmatprep.subr.bf16.mxu1 %v4424_v0 }
 0x7b6   :  { %v1077_v47 = vadd.f32 %v1066_v44, %v960_v32 }
 0x7b7   :  { %v1070_v48 = vpop.f32.mrb[40].mxu1 }
 0x7b8   :  { %v1071_v49 = vadd.f32 %v3445_v26, %v1070_v48  ;;  %v3822_v50 = vpop.f32.mrb[41].mxu1  ;;  %v1088_v51 = vsel %vm161_vm7, %v1077_v47, 0.0 }
 0x7b9   :  { %1089 = vadd.xlane.f32.xlu1 %v1088_v51 }
 0x7ba   :  { %v1078_v52 = vadd.f32 %v1071_v49, %v961_v25 }
 0x7bc   :  { %v1091_v53 = vsel %vm161_vm7, %v1078_v52, 0.0 }
 0x7bd   :  { %1092 = vadd.xlane.f32.xlu0 %v1091_v53 }
 0x83a   :  { %v1081_v54 = vpop.xlane.xlu0 %1080 }
 0x83b   :  { %v1094_v55 = vmul.f32 0.09090909, %v1081_v54 }
 0x83d   :  { %v1099_v56 = vsub.f32 %v1074_v30, %v1094_v55 }
 0x83e   :  { %v1084_v57 = vpop.xlane.xlu1 %1083 }
 0x83f   :  { %v1095_v58 = vmul.f32 0.09090909, %v1084_v57  ;;  %v1104_v59 = vmul.f32 %v1099_v56, %v1099_v56 }
 0x841   :  { %v1100_v60 = vsub.f32 %v1075_v39, %v1095_v58  ;;  %v1109_v61 = vsel %vm161_vm7, %v1104_v59, 0.0  ;;  %v1162_v59 = vld [vmem:[#allocation2 + $0xf0] sm:$0xff] }
 0x842   :  { %1110 = vadd.xlane.f32.xlu1 %v1109_v61  ;;  %v1087_v62 = vpop.xlane.xlu0 %1086 }
 0x843   :  { %v1096_v63 = vmul.f32 0.09090909, %v1087_v62  ;;  %v1105_v2 = vmul.f32 %v1100_v60, %v1100_v60  ;;  %v1391_v62 = vlaneseq }
 0x845   :  { %v1101_v3 = vsub.f32 %v1076_v42, %v1096_v63  ;;  %v1112_v4 = vsel %vm161_vm7, %v1105_v2, 0.0  ;;  %v1392_v63 = vand.u32 127, %v1391_v62  ;;  %v4711_v2 = vld [vmem:[#allocation2 + $0x99] ss:$0 sm:$0xff] }
 0x846   :  { %v1090_v5 = vpop.xlane.xlu1 %1089  ;;  %1113 = vadd.xlane.f32.xlu0 %v1112_v4  ;;  %v4428_v4 = vmov 1.0  }
 0x847   :  { %v1097_v6 = vmul.f32 0.09090909, %v1090_v5  ;;  %v1106_v7 = vmul.f32 %v1101_v3, %v1101_v3  ;;  %vm1393_vm10 = vcmp.lt.s32.totalorder %v1392_v63, 96 }
 0x848   :  { %v4713_v5 = vsel %vm1393_vm10, 0.5, %v4428_v4 }
 0x849   :  { %v1102_v8 = vsub.f32 %v1077_v47, %v1097_v6  ;;  %v1115_v9 = vsel %vm161_vm7, %v1106_v7, 0.0 }
 0x84a   :  { %1116 = vadd.xlane.f32.xlu1 %v1115_v9  ;;  %v1093_v11 = vpop.xlane.xlu0 %1092 }
 0x84b   :  { %v1098_v12 = vmul.f32 0.09090909, %v1093_v11  ;;  %v1107_v13 = vmul.f32 %v1102_v8, %v1102_v8  ;;  %v4721_v11 = vsel %vm1393_vm10, 0.5, %v4426_v1 }
 0x84d   :  { %v1103_v14 = vsub.f32 %v1078_v52, %v1098_v12  ;;  %v1118_v15 = vsel %vm161_vm7, %v1107_v13, 0.0 }
 0x84e   :  { %1119 = vadd.xlane.f32.xlu0 %v1118_v15 }
 0x84f   :  { %v1108_v22 = vmul.f32 %v1103_v14, %v1103_v14 }
 0x851   :  { %v1121_v16 = vsel %vm161_vm7, %v1108_v22, 0.0 }
 0x852   :  { %1122 = vadd.xlane.f32.xlu1 %v1121_v16  ;;  %v1163_v16 = vld [vmem:[#allocation2 + $0xf8] sm:$0xff] }
 0x8cf   :  { %v1111_v28 = vpop.xlane.xlu1 %1110 }
 0x8d0   :  { %v1124_v20 = vmul.f32 0.09090909, %v1111_v28  ;;  %v4730_v28 = vpack.c.bf16 %v1275_v18, %v1274_v17 }
 0x8d2   :  { %v1129_v21 = vadd.f32 1e-05, %v1124_v20  ;;  %v1276_v20 = vld [vmem:[#allocation2 + $0x80] sm:$0xff] }
 0x8d3   :  { %v1114_v32 = vpop.xlane.xlu0 %1113 }
 0x8d4   :  { %4282 = vrsqrt.f32 %v1129_v21  ;;  %v1125_v23 = vmul.f32 0.09090909, %v1114_v32  ;;  %v1277_v21 = vld [vmem:[#allocation2 + $0x88] sm:$0xff] }
 0x8d5   :  { %v4733_v32 = vpack.c.bf16 %v1277_v21, %v1276_v20 }
 0x8d6   :  { %v1130_v24 = vadd.f32 1e-05, %v1125_v23  ;;  %v1165_v23 = vld [vmem:[#allocation2 + $0x108] sm:$0xff] }
 0x8d7   :  { %v1117_v25 = vpop.xlane.xlu1 %1116 }
 0x8d8   :  { %4284 = vrsqrt.f32 %v1130_v24  ;;  %v1126_v26 = vmul.f32 0.09090909, %v1117_v25  ;;  %v1166_v25 = vld [vmem:[#allocation2 + $0x110] sm:$0xff] }
 0x8da   :  { %v1131_v27 = vadd.f32 1e-05, %v1126_v26 }
 0x8db   :  { %v1120_v29 = vpop.xlane.xlu0 %1119 }
 0x8dc   :  { %4286 = vrsqrt.f32 %v1131_v27  ;;  %v1127_v37 = vmul.f32 0.09090909, %v1120_v29 }
 0x8de   :  { %v4283_v30 = vpop.eup %4282  ;;  %v1132_v31 = vadd.f32 1e-05, %v1127_v37 }
 0x8df   :  { %v1139_v10 = vmul.f32 %v4283_v30, %v1099_v56  ;;  %v1123_v33 = vpop.xlane.xlu1 %1122 }
 0x8e0   :  { %4288 = vrsqrt.f32 %v1132_v31  ;;  %v1128_v34 = vmul.f32 0.09090909, %v1123_v33 }
 0x8e1   :  { %v1148_v40 = vmul.f32 %v3452_v35, %v1139_v10 }
 0x8e2   :  { %v4285_v39 = vpop.eup %4284  ;;  %v1133_v36 = vadd.f32 1e-05, %v1128_v34 }
 0x8e3   :  { %v1140_v38 = vmul.f32 %v4285_v39, %v1100_v60  ;;  %v1157_v45 = vadd.f32 %v3453_v41, %v1148_v40 }
 0x8e4   :  { %4290 = vrsqrt.f32 %v1133_v36 }
 0x8e5   :  { %v1149_v42 = vmul.f32 %v3452_v35, %v1140_v38 }
 0x8e6   :  { %v4287_v43 = vpop.eup %4286 }
 0x8e7   :  { %v1141_v44 = vmul.f32 %v4287_v43, %v1101_v3  ;;  %v1158_v46 = vadd.f32 %v3453_v41, %v1149_v42 }
 0x8e9   :  { %v4115_v47 = vpack.c.bf16 %v1158_v46, %v1157_v45  ;;  %v1150_v50 = vmul.f32 %v3452_v35, %v1141_v44 }
 0x8ea   :  { %v4289_v48 = vpop.eup %4288 }
 0x8eb   :  { %v1142_v49 = vmul.f32 %v4289_v48, %v1102_v8  ;;  %4116 = vmatpush3.bf16.msra.mxu0 %v4115_v47  ;;  %v1159_v53 = vadd.f32 %v3453_v41, %v1150_v50 }
 0x8ec   :  { %4117 = vmatprep.subr.bf16.mxu0 %v4424_v0 }
 0x8ed   :  { %v1151_v51 = vmul.f32 %v3452_v35, %v1142_v49 }
 0x8ee   :  { %v4291_v52 = vpop.eup %4290 }
 0x8ef   :  { %v1160_v54 = vadd.f32 %v3453_v41, %v1151_v51  ;;  %v1143_v55 = vmul.f32 %v4291_v52, %v1103_v14 }
 0x8f1   :  { %v4118_v56 = vpack.c.bf16 %v1160_v54, %v1159_v53  ;;  %v1152_v57 = vmul.f32 %v3452_v35, %v1143_v55 }
 0x8f3   :  { %4119 = vmatpush3.bf16.msra.mxu0 %v4118_v56  ;;  %v1161_v58 = vadd.f32 %v3453_v41, %v1152_v57 }
 0x8f4   :  { %3831 = vmatprep.subr.mxu0 %v4426_v1 }
 0x8f7   :  { %3832 = vmatpush3.msra.mxu0 %v1161_v58 }
 0x8f8   :  { %3834 = vmatmul.mubr.msk.f32.vlgmr.msra.gmra.mrb[38].mxu0 %vm590_vm9, %v1162_v59  ;;  %4124 = vmatprep.subr.bf16.mxu0 %v4424_v0 }
 0x8f9   :  { %3836 = vmatprep.mubr.msk.f32.mxu0 %vm4425_vm0, %v4426_v1  ;;  %4126 = vmatpush3.bf16.msra.mxu0 %v4730_v28 }
 0x8fa   :  { %4127 = vmatprep.subr.bf16.mxu0 %v4424_v0 }
 0x8fc   :  { %3837 = vmatmul.mubr.msk.f32.gmra.mrb[40].mxu0 %vm590_vm9, %v1163_v16 }
 0x8fd   :  { %3839 = vmatprep.mubr.msk.f32.mxu0 %vm4425_vm0, %v4426_v1  ;;  %4129 = vmatpush3.bf16.msra.mxu0 %v4733_v32 }
 0x8fe   :  { %4136 = vmatprep.subr.bf16.mxu0 %v4424_v0 }
 0x900   :  { %3840 = vmatmul.mubr.msk.f32.gmra.mrb[42].mxu0 %vm590_vm9, %v1164_v19 }
 0x901   :  { %3842 = vmatprep.mubr.msk.f32.mxu0 %vm4425_vm0, %v4426_v1 }
 0x904   :  { %3843 = vmatmul.mubr.msk.f32.gmra.mrb[44].mxu0 %vm590_vm9, %v1165_v23 }
 0x905   :  { %3845 = vmatprep.mubr.msk.f32.mxu0 %vm4425_vm0, %v4426_v1 }
 0x908   :  { %3846 = vmatmul.mubr.msk.f32.gmra.mrb[46].mxu0 %vm590_vm9, %v1166_v25 }
 0x909   :  { %3875 = vmatprep.mubr.msk.f32.mxu0 %vm4425_vm0, %v4426_v1 }
 0x9cb   :  { %v1248_v60 = vpop.f32.mrb[38].mxu0 }
 0x9cc   :  { %3853 = vmatmul.mubr.msk.f32.vlgmr.msra.gmra.mrb[42].mxu1 %vm161_vm7, %v1248_v60  ;;  %v3835_v61 = vpop.f32.mrb[39].mxu0 }
 0x9cd   :  { %3855 = vmatprep.mubr.msk.f32.mxu1 %vm4425_vm0, %v4426_v1  ;;  %4132 = vmatpush3.bf16.msra.mxu1 %v4730_v28 }
 0x9ce   :  { %4133 = vmatprep.subr.bf16.mxu1 %v4424_v0 }
 0x9cf   :  { %v1253_v29 = vpop.f32.mrb[40].mxu0 }
 0x9d0   :  { %v3838_v37 = vpop.f32.mrb[41].mxu0  ;;  %3856 = vmatmul.mubr.msk.f32.gmra.mrb[44].mxu1 %vm161_vm7, %v1253_v29 }
 0x9d1   :  { %4135 = vmatpush3.bf16.msra.mxu1 %v4733_v32  ;;  %3858 = vmatprep.mubr.msk.f32.mxu1 %vm4425_vm0, %v4426_v1 }
 0x9d2   :  { %4142 = vmatprep.subr.bf16.mxu1 %v4424_v0 }
 0x9d3   :  { %v1258_v30 = vpop.f32.mrb[42].mxu0 }
 0x9d4   :  { %v3841_v31 = vpop.f32.mrb[43].mxu0  ;;  %3859 = vmatmul.mubr.msk.f32.gmra.mrb[46].mxu1 %vm161_vm7, %v1258_v30 }
 0x9d5   :  { %3861 = vmatprep.mubr.msk.f32.mxu1 %vm4425_vm0, %v4426_v1 }
 0x9d7   :  { %v1263_v10 = vpop.f32.mrb[44].mxu0 }
 0x9d8   :  { %v3844_v33 = vpop.f32.mrb[45].mxu0  ;;  %3862 = vmatmul.mubr.msk.f32.gmra.mrb[48].mxu1 %vm161_vm7, %v1263_v10 }
 0x9d9   :  { %3864 = vmatprep.mubr.msk.f32.mxu1 %vm4425_vm0, %v4426_v1 }
 0x9db   :  { %v1268_v34 = vpop.f32.mrb[46].mxu0 }
 0x9dc   :  { %v3847_v35 = vpop.f32.mrb[47].mxu0  ;;  %3865 = vmatmul.mubr.msk.f32.gmra.mrb[50].mxu1 %vm161_vm7, %v1268_v34 }
 0x9dd   :  { %3886 = vmatprep.mubr.msk.f32.mxu1 %vm4425_vm0, %v4426_v1 }
 0xa9f   :  { %v1367_v3 = vpop.f32.mrb[42].mxu1 }
 0xaa0   :  { %v4716_v6 = vadd.f32 %v4711_v2, %v1367_v3  ;;  %v3854_v7 = vpop.f32.mrb[43].mxu1 }
 0xaa2   :  { %v1396_v8 = vmul.f32 %v4713_v5, %v4716_v6 }
 0xaa3   :  { %v4773_v43 = vpop.f32.mrb[44].mxu1 }
 0xaa4   :  { %4292 = vtanh.f32 %v1396_v8  ;;  %v3857_v44 = vpop.f32.mrb[45].mxu1 }
 0xaa7   :  { %v4775_v45 = vpop.f32.mrb[46].mxu1 }
 0xaa8   :  { %v3860_v46 = vpop.f32.mrb[47].mxu1 }
 0xaab   :  { %v4777_v47 = vpop.f32.mrb[48].mxu1 }
 0xaac   :  { %v3863_v48 = vpop.f32.mrb[49].mxu1 }
 0xaae   :  { %v4293_v9 = vpop.eup %4292 }
 0xaaf   :  { %v1398_v12 = vmul.f32 %v4293_v9, %v4713_v5  ;;  %v4779_v50 = vpop.f32.mrb[50].mxu1 }
 0xab0   :  { %v3866_v52 = vpop.f32.mrb[51].mxu1 }
 0xab1   :  { %v1399_v13 = vadd.f32 %v1398_v12, %v4721_v11 }
 0xab3   :  { %1401 = vrot.lane.b32.xlu0 %v1399_v13, %s4429_s0 }
 0xb25   :  { %v1402_v14 = vpop.permute.xlu0 %1401 }
 0xb26   :  { %v1404_v15 = vmul.f32 %v1402_v14, %v1399_v13 }
 0xb28   :  { %4294 = vtanh.f32 %v1404_v15  ;;  %v1496_v22 = vrot.slane %v1404_v15, 6 }
 0xb2a   :  { %1497 = vrot.lane.b32.xlu0 %v1496_v22, %s4430_s4 }
 0xb32   :  { %v4295_v24 = vpop.eup %4294 }
 0xb33   :  { %1407 = vrot.lane.b32.xlu1 %v4295_v24, %s4431_s5 }
 0xb9c   :  { %v1498_v56 = vpop.permute.xlu0 %1497 }
 0xba5   :  { %v1408_v26 = vpop.permute.xlu1 %1407 }
 0xba6   :  { %v1410_v27 = vmul.f32 %v1408_v26, %v1399_v13 }
 0xba8   :  { %1412 = vrot.lane.b32.xlu1 %v1410_v27, %s4429_s0 }
 0xc1a   :  { %v1413_v39 = vpop.permute.xlu1 %1412 }
 0xc1b   :  { %3876 = vmatmul.mubr.msk.f32.vlgmr.msra.gmra.mrb[48].mxu0 %vm1414_vm11, %v1413_v39 }
 0xc1c   :  { %4138 = vmatpush3.bf16.msra.mxu0 %v4730_v28  ;;  %3897 = vmatprep.mubr.msk.f32.mxu0 %vm4425_vm0, %v4426_v1 }
 0xc1d   :  { %4139 = vmatprep.subr.bf16.mxu0 %v4424_v0 }
 0xc20   :  { %4141 = vmatpush3.bf16.msra.mxu0 %v4733_v32 }
 0xc21   :  { %4148 = vmatprep.subr.bf16.mxu0 %v4424_v0 }
 0xcee   :  { %v1483_v36 = vpop.f32.mrb[48].mxu0 }
 0xcef   :  { %v1488_v38 = vrot.slane %v1483_v36, 6  ;;  %v3877_v40 = vpop.f32.mrb[49].mxu0 }
 0xcf1   :  { %v1490_v41 = vadd.f32 %v1488_v38, %v4716_v6 }
 0xcf3   :  { %v1491_v42 = vmul.f32 %v1490_v41, %v4713_v5 }
 0xcf5   :  { %4296 = vtanh.f32 %v1491_v42 }
 0xcff   :  { %v4297_v49 = vpop.eup %4296 }
 0xd00   :  { %v1493_v51 = vmul.f32 %v4297_v49, %v4713_v5  ;;  %v4826_v49 = vadd.f32 %v4711_v2, %v4773_v43 }
 0xd02   :  { %v1494_v53 = vadd.f32 %v1493_v51, %v4721_v11 }
 0xd04   :  { %1502 = vrot.lane.b32.xlu1 %v1494_v53, %s4429_s0  ;;  %v1500_v57 = vmul.f32 %v1498_v56, %v1494_v53 }
 0xd76   :  { %v1503_v54 = vpop.permute.xlu1 %1502 }
 0xd77   :  { %v1505_v55 = vmul.f32 %v1503_v54, %v1494_v53 }
 0xd79   :  { %1507 = vrot.lane.b32.xlu1 %v1505_v55, %s4430_s4 }
 0xdeb   :  { %v1508_v58 = vpop.permute.xlu1 %1507 }
 0xdec   :  { %v1510_v59 = vadd.f32 %v1508_v58, %v1500_v57 }
 0xdee   :  { %4298 = vtanh.f32 %v1510_v59  ;;  %v1602_v17 = vrot.slane %v1510_v59, 6 }
 0xdf8   :  { %v4299_v60 = vpop.eup %4298 }
 0xdf9   :  { %1513 = vrot.lane.b32.xlu0 %v4299_v60, %s4429_s0 }
 0xe6b   :  { %v1514_v61 = vpop.permute.xlu0 %1513 }
 0xe6c   :  { %v1516_v62 = vmul.f32 %v1514_v61, %v1494_v53 }
 0xe6e   :  { %v1518_v63 = vrot.slane %v1516_v62, 2 }
 0xe70   :  { %1519 = vrot.lane.b32.xlu1 %v1518_v63, %s4429_s0 }
 0xee2   :  { %v1520_v3 = vpop.permute.xlu1 %1519 }
 0xee3   :  { %3887 = vmatmul.mubr.msk.f32.vlgmr.msra.gmra.mrb[52].mxu1 %vm1414_vm11, %v1520_v3 }
 0xee4   :  { %4144 = vmatpush3.bf16.msra.mxu1 %v4730_v28  ;;  %3908 = vmatprep.mubr.msk.f32.mxu1 %vm4425_vm0, %v4426_v1 }
 0xee5   :  { %4145 = vmatprep.subr.bf16.mxu1 %v4424_v0 }
 0xee8   :  { %4147 = vmatpush3.bf16.msra.mxu1 %v4733_v32 }
 0xee9   :  { %4154 = vmatprep.subr.bf16.mxu1 %v4424_v0 }
 0xfb6   :  { %v1589_v4 = vpop.f32.mrb[52].mxu1 }
 0xfb7   :  { %v1594_v7 = vrot.slane %v1589_v4, 4  ;;  %v3888_v8 = vpop.f32.mrb[53].mxu1 }
 0xfb9   :  { %v1596_v9 = vadd.f32 %v1594_v7, %v4716_v6 }
 0xfbb   :  { %v1597_v12 = vmul.f32 %v1596_v9, %v4713_v5 }
 0xfbd   :  { %4300 = vtanh.f32 %v1597_v12 }
 0xfc7   :  { %v4301_v13 = vpop.eup %4300 }
 0xfc8   :  { %v1599_v14 = vmul.f32 %v4301_v13, %v4713_v5 }
 0xfca   :  { %v1600_v15 = vadd.f32 %v1599_v14, %v4721_v11 }
 0xfcc   :  { %1606 = vrot.lane.b32.xlu0 %v1600_v15, %s4429_s0  ;;  %v1604_v18 = vmul.f32 %v1602_v17, %v1600_v15 }
0x103e   :  { %v1607_v22 = vpop.permute.xlu0 %1606 }
0x103f   :  { %v1609_v16 = vmul.f32 %v1607_v22, %v1600_v15 }
0x1041   :  { %1611 = vrot.lane.b32.xlu1 %v1609_v16, %s4430_s4 }
0x10b3   :  { %v1612_v19 = vpop.permute.xlu1 %1611 }
0x10b4   :  { %v1614_v20 = vadd.f32 %v1612_v19, %v1604_v18 }
0x10b6   :  { %4302 = vtanh.f32 %v1614_v20  ;;  %v1706_v36 = vrot.slane %v1614_v20, 6 }
0x10c0   :  { %v4303_v21 = vpop.eup %4302 }
0x10c1   :  { %1617 = vrot.lane.b32.xlu0 %v4303_v21, %s4429_s0 }
0x1133   :  { %v1618_v23 = vpop.permute.xlu0 %1617 }
0x1134   :  { %v1620_v24 = vmul.f32 %v1618_v23, %v1600_v15 }
0x1136   :  { %v1622_v25 = vrot.slane %v1620_v24, 4 }
0x1138   :  { %1623 = vrot.lane.b32.xlu1 %v1622_v25, %s4429_s0 }
0x11aa   :  { %v1624_v26 = vpop.permute.xlu1 %1623 }
0x11ab   :  { %3898 = vmatmul.mubr.msk.f32.vlgmr.msra.gmra.mrb[50].mxu0 %vm1414_vm11, %v1624_v26 }
0x11ac   :  { %4150 = vmatpush3.bf16.msra.mxu0 %v4730_v28  ;;  %3919 = vmatprep.mubr.msk.f32.mxu0 %vm4425_vm0, %v4426_v1 }
0x11ad   :  { %4151 = vmatprep.subr.bf16.mxu0 %v4424_v0 }
0x11b0   :  { %4153 = vmatpush3.bf16.msra.mxu0 %v4733_v32 }
0x11b1   :  { %4160 = vmatprep.subr.bf16.mxu0 %v4424_v0 }
0x127e   :  { %v1693_v27 = vpop.f32.mrb[50].mxu0 }
0x127f   :  { %v1698_v29 = vrot.slane %v1693_v27, 2  ;;  %v3899_v37 = vpop.f32.mrb[51].mxu0 }
0x1281   :  { %v1700_v30 = vadd.f32 %v1698_v29, %v4716_v6 }
0x1283   :  { %v1701_v31 = vmul.f32 %v1700_v30, %v4713_v5 }
0x1285   :  { %4304 = vtanh.f32 %v1701_v31 }
0x128f   :  { %v4305_v10 = vpop.eup %4304 }
0x1290   :  { %v1703_v33 = vmul.f32 %v4305_v10, %v4713_v5 }
0x1292   :  { %v1704_v34 = vadd.f32 %v1703_v33, %v4721_v11 }
0x1294   :  { %1710 = vrot.lane.b32.xlu0 %v1704_v34, %s4429_s0  ;;  %v1708_v38 = vmul.f32 %v1706_v36, %v1704_v34 }
0x1306   :  { %v1711_v35 = vpop.permute.xlu0 %1710 }
0x1307   :  { %v1713_v39 = vmul.f32 %v1711_v35, %v1704_v34 }
0x1309   :  { %1715 = vrot.lane.b32.xlu1 %v1713_v39, %s4430_s4 }
0x137b   :  { %v1716_v40 = vpop.permute.xlu1 %1715 }
0x137c   :  { %v1718_v41 = vadd.f32 %v1716_v40, %v1708_v38 }
0x137e   :  { %4306 = vtanh.f32 %v1718_v41  ;;  %v1807_v43 = vrot.slane %v1718_v41, 6 }
0x1388   :  { %v4307_v6 = vpop.eup %4306 }
0x1389   :  { %1721 = vrot.lane.b32.xlu0 %v4307_v6, %s4429_s0 }
0x13fb   :  { %v1722_v42 = vpop.permute.xlu0 %1721 }
0x13fc   :  { %v1724_v44 = vmul.f32 %v1722_v42, %v1704_v34 }
0x13fe   :  { %v1726_v46 = vrot.slane %v1724_v44, 6 }
0x1400   :  { %1727 = vrot.lane.b32.xlu1 %v1726_v46, %s4429_s0 }
0x1472   :  { %v1728_v48 = vpop.permute.xlu1 %1727 }
0x1473   :  { %3909 = vmatmul.mubr.msk.f32.vlgmr.msra.gmra.mrb[54].mxu1 %vm1414_vm11, %v1728_v48 }
0x1474   :  { %4156 = vmatpush3.bf16.msra.mxu1 %v4730_v28  ;;  %3930 = vmatprep.mubr.msk.f32.mxu1 %vm4425_vm0, %v4426_v1 }
0x1475   :  { %4157 = vmatprep.subr.bf16.mxu1 %v4424_v0 }
0x1478   :  { %4159 = vmatpush3.bf16.msra.mxu1 %v4733_v32 }
0x1479   :  { %4166 = vmatprep.subr.bf16.mxu1 %v4424_v0 }
0x1546   :  { %v1797_v51 = vpop.f32.mrb[54].mxu1 }
0x1547   :  { %v1801_v52 = vadd.f32 %v1797_v51, %v4826_v49  ;;  %v3910_v53 = vpop.f32.mrb[55].mxu1 }
0x1549   :  { %v1802_v54 = vmul.f32 %v1801_v52, %v4713_v5 }
0x154b   :  { %4308 = vtanh.f32 %v1802_v54 }
0x1555   :  { %v4309_v55 = vpop.eup %4308 }
0x1556   :  { %v1804_v56 = vmul.f32 %v4309_v55, %v4713_v5 }
0x1558   :  { %v1805_v57 = vadd.f32 %v1804_v56, %v4721_v11 }
0x155a   :  { %1811 = vrot.lane.b32.xlu0 %v1805_v57, %s4429_s0  ;;  %v1809_v60 = vmul.f32 %v1807_v43, %v1805_v57 }
0x15cc   :  { %v1812_v58 = vpop.permute.xlu0 %1811 }
0x15cd   :  { %v1814_v59 = vmul.f32 %v1812_v58, %v1805_v57 }
0x15cf   :  { %1816 = vrot.lane.b32.xlu1 %v1814_v59, %s4430_s4 }
0x1641   :  { %v1817_v61 = vpop.permute.xlu1 %1816 }
0x1642   :  { %v1819_v62 = vadd.f32 %v1817_v61, %v1809_v60 }
0x1644   :  { %4310 = vtanh.f32 %v1819_v62  ;;  %v1910_v19 = vrot.slane %v1819_v62, 6 }
0x164e   :  { %v4311_v63 = vpop.eup %4310 }
0x164f   :  { %1822 = vrot.lane.b32.xlu0 %v4311_v63, %s4429_s0 }
0x16c1   :  { %v1823_v3 = vpop.permute.xlu0 %1822 }
0x16c2   :  { %v1825_v4 = vmul.f32 %v1823_v3, %v1805_v57 }
0x16c4   :  { %1827 = vrot.lane.b32.xlu1 %v1825_v4, %s4429_s0 }
0x1736   :  { %v1828_v7 = vpop.permute.xlu1 %1827 }
0x1737   :  { %3920 = vmatmul.mubr.msk.f32.vlgmr.msra.gmra.mrb[52].mxu0 %vm1414_vm11, %v1828_v7 }
0x1738   :  { %4162 = vmatpush3.bf16.msra.mxu0 %v4730_v28  ;;  %3941 = vmatprep.mubr.msk.f32.mxu0 %vm4425_vm0, %v4426_v1 }
0x1739   :  { %4163 = vmatprep.subr.bf16.mxu0 %v4424_v0 }
0x173c   :  { %4165 = vmatpush3.bf16.msra.mxu0 %v4733_v32 }
0x173d   :  { %4172 = vmatprep.subr.bf16.mxu0 %v4424_v0 }
0x180a   :  { %v1897_v8 = vpop.f32.mrb[52].mxu0 }
0x180b   :  { %v1902_v9 = vrot.slane %v1897_v8, 6  ;;  %v3921_v12 = vpop.f32.mrb[53].mxu0 }
0x180d   :  { %v1904_v13 = vadd.f32 %v1902_v9, %v4826_v49 }
0x180f   :  { %v1905_v14 = vmul.f32 %v1904_v13, %v4713_v5  ;;  %v4890_v13 = vadd.f32 %v4711_v2, %v4775_v45 }
0x1811   :  { %4312 = vtanh.f32 %v1905_v14 }
0x181b   :  { %v4313_v15 = vpop.eup %4312 }
0x181c   :  { %v1907_v22 = vmul.f32 %v4313_v15, %v4713_v5 }
0x181e   :  { %v1908_v16 = vadd.f32 %v1907_v22, %v4721_v11 }
0x1820   :  { %1914 = vrot.lane.b32.xlu0 %v1908_v16, %s4429_s0  ;;  %v1912_v20 = vmul.f32 %v1910_v19, %v1908_v16 }
0x1892   :  { %v1915_v17 = vpop.permute.xlu0 %1914 }
0x1893   :  { %v1917_v18 = vmul.f32 %v1915_v17, %v1908_v16 }
0x1895   :  { %1919 = vrot.lane.b32.xlu1 %v1917_v18, %s4430_s4 }
0x1907   :  { %v1920_v21 = vpop.permute.xlu1 %1919 }
0x1908   :  { %v1922_v23 = vadd.f32 %v1920_v21, %v1912_v20 }
0x190a   :  { %4314 = vtanh.f32 %v1922_v23  ;;  %v2014_v40 = vrot.slane %v1922_v23, 6 }
0x1914   :  { %v4315_v24 = vpop.eup %4314 }
0x1915   :  { %1925 = vrot.lane.b32.xlu0 %v4315_v24, %s4429_s0 }
0x1987   :  { %v1926_v25 = vpop.permute.xlu0 %1925 }
0x1988   :  { %v1928_v26 = vmul.f32 %v1926_v25, %v1908_v16 }
0x198a   :  { %v1930_v27 = vrot.slane %v1928_v26, 2 }
0x198c   :  { %1931 = vrot.lane.b32.xlu1 %v1930_v27, %s4429_s0 }
0x19fe   :  { %v1932_v29 = vpop.permute.xlu1 %1931 }
0x19ff   :  { %3931 = vmatmul.mubr.msk.f32.vlgmr.msra.gmra.mrb[56].mxu1 %vm1414_vm11, %v1932_v29 }
0x1a00   :  { %4168 = vmatpush3.bf16.msra.mxu1 %v4730_v28  ;;  %3952 = vmatprep.mubr.msk.f32.mxu1 %vm4425_vm0, %v4426_v1 }
0x1a01   :  { %4169 = vmatprep.subr.bf16.mxu1 %v4424_v0 }
0x1a04   :  { %4171 = vmatpush3.bf16.msra.mxu1 %v4733_v32 }
0x1a05   :  { %4178 = vmatprep.subr.bf16.mxu1 %v4424_v0 }
0x1ad2   :  { %v2001_v37 = vpop.f32.mrb[56].mxu1 }
0x1ad3   :  { %v2006_v30 = vrot.slane %v2001_v37, 4  ;;  %v3932_v31 = vpop.f32.mrb[57].mxu1 }
0x1ad5   :  { %v2008_v10 = vadd.f32 %v2006_v30, %v4826_v49 }
0x1ad7   :  { %v2009_v33 = vmul.f32 %v2008_v10, %v4713_v5 }
0x1ad9   :  { %4316 = vtanh.f32 %v2009_v33 }
0x1ae3   :  { %v4317_v34 = vpop.eup %4316 }
0x1ae4   :  { %v2011_v35 = vmul.f32 %v4317_v34, %v4713_v5 }
0x1ae6   :  { %v2012_v39 = vadd.f32 %v2011_v35, %v4721_v11 }
0x1ae8   :  { %2018 = vrot.lane.b32.xlu0 %v2012_v39, %s4429_s0  ;;  %v2016_v41 = vmul.f32 %v2014_v40, %v2012_v39 }
0x1b5a   :  { %v2019_v36 = vpop.permute.xlu0 %2018 }
0x1b5b   :  { %v2021_v38 = vmul.f32 %v2019_v36, %v2012_v39 }
0x1b5d   :  { %2023 = vrot.lane.b32.xlu1 %v2021_v38, %s4430_s4 }
0x1bcf   :  { %v2024_v6 = vpop.permute.xlu1 %2023 }
0x1bd0   :  { %v2026_v42 = vadd.f32 %v2024_v6, %v2016_v41 }
0x1bd2   :  { %4318 = vtanh.f32 %v2026_v42  ;;  %v2118_v62 = vrot.slane %v2026_v42, 6 }
0x1bdc   :  { %v4319_v44 = vpop.eup %4318 }
0x1bdd   :  { %2029 = vrot.lane.b32.xlu0 %v4319_v44, %s4429_s0 }
0x1c4f   :  { %v2030_v46 = vpop.permute.xlu0 %2029 }
0x1c50   :  { %v2032_v48 = vmul.f32 %v2030_v46, %v2012_v39 }
0x1c52   :  { %v2034_v51 = vrot.slane %v2032_v48, 4 }
0x1c54   :  { %2035 = vrot.lane.b32.xlu1 %v2034_v51, %s4429_s0 }
0x1cc6   :  { %v2036_v52 = vpop.permute.xlu1 %2035 }
0x1cc7   :  { %3942 = vmatmul.mubr.msk.f32.vlgmr.msra.gmra.mrb[54].mxu0 %vm1414_vm11, %v2036_v52 }
0x1cc8   :  { %4174 = vmatpush3.bf16.msra.mxu0 %v4730_v28  ;;  %3963 = vmatprep.mubr.msk.f32.mxu0 %vm4425_vm0, %v4426_v1 }
0x1cc9   :  { %4175 = vmatprep.subr.bf16.mxu0 %v4424_v0 }
0x1ccc   :  { %4177 = vmatpush3.bf16.msra.mxu0 %v4733_v32 }
0x1ccd   :  { %4184 = vmatprep.subr.bf16.mxu0 %v4424_v0 }
0x1d9a   :  { %v2105_v53 = vpop.f32.mrb[54].mxu0 }
0x1d9b   :  { %v2110_v54 = vrot.slane %v2105_v53, 2  ;;  %v3943_v55 = vpop.f32.mrb[55].mxu0 }
0x1d9d   :  { %v2112_v56 = vadd.f32 %v2110_v54, %v4826_v49 }
0x1d9f   :  { %v2113_v57 = vmul.f32 %v2112_v56, %v4713_v5 }
0x1da1   :  { %4320 = vtanh.f32 %v2113_v57 }
0x1dab   :  { %v4321_v58 = vpop.eup %4320 }
0x1dac   :  { %v2115_v59 = vmul.f32 %v4321_v58, %v4713_v5 }
0x1dae   :  { %v2116_v43 = vadd.f32 %v2115_v59, %v4721_v11 }
0x1db0   :  { %2122 = vrot.lane.b32.xlu0 %v2116_v43, %s4429_s0  ;;  %v2120_v63 = vmul.f32 %v2118_v62, %v2116_v43 }
0x1e22   :  { %v2123_v60 = vpop.permute.xlu0 %2122 }
0x1e23   :  { %v2125_v61 = vmul.f32 %v2123_v60, %v2116_v43 }
0x1e25   :  { %2127 = vrot.lane.b32.xlu1 %v2125_v61, %s4430_s4 }
0x1e97   :  { %v2128_v3 = vpop.permute.xlu1 %2127 }
0x1e98   :  { %v2130_v4 = vadd.f32 %v2128_v3, %v2120_v63 }
0x1e9a   :  { %4322 = vtanh.f32 %v2130_v4  ;;  %v2219_v45 = vrot.slane %v2130_v4, 6 }
0x1ea4   :  { %v4323_v49 = vpop.eup %4322 }
0x1ea5   :  { %2133 = vrot.lane.b32.xlu0 %v4323_v49, %s4429_s0 }
0x1f17   :  { %v2134_v7 = vpop.permute.xlu0 %2133 }
0x1f18   :  { %v2136_v8 = vmul.f32 %v2134_v7, %v2116_v43 }
0x1f1a   :  { %v2138_v9 = vrot.slane %v2136_v8, 6 }
0x1f1c   :  { %2139 = vrot.lane.b32.xlu1 %v2138_v9, %s4429_s0 }
0x1f8e   :  { %v2140_v12 = vpop.permute.xlu1 %2139 }
0x1f8f   :  { %3953 = vmatmul.mubr.msk.f32.vlgmr.msra.gmra.mrb[58].mxu1 %vm1414_vm11, %v2140_v12 }
0x1f90   :  { %4180 = vmatpush3.bf16.msra.mxu1 %v4730_v28  ;;  %3974 = vmatprep.mubr.msk.f32.mxu1 %vm4425_vm0, %v4426_v1 }
0x1f91   :  { %4181 = vmatprep.subr.bf16.mxu1 %v4424_v0 }
0x1f94   :  { %4183 = vmatpush3.bf16.msra.mxu1 %v4733_v32 }
0x1f95   :  { %4190 = vmatprep.subr.bf16.mxu1 %v4424_v0 }
0x2062   :  { %v2209_v14 = vpop.f32.mrb[58].mxu1 }
0x2063   :  { %v2213_v15 = vadd.f32 %v2209_v14, %v4890_v13  ;;  %v3954_v22 = vpop.f32.mrb[59].mxu1 }
0x2065   :  { %v2214_v16 = vmul.f32 %v2213_v15, %v4713_v5 }
0x2067   :  { %4324 = vtanh.f32 %v2214_v16 }
0x2071   :  { %v4325_v17 = vpop.eup %4324 }
0x2072   :  { %v2216_v18 = vmul.f32 %v4325_v17, %v4713_v5 }
0x2074   :  { %v2217_v19 = vadd.f32 %v2216_v18, %v4721_v11 }
0x2076   :  { %2223 = vrot.lane.b32.xlu0 %v2217_v19, %s4429_s0  ;;  %v2221_v23 = vmul.f32 %v2219_v45, %v2217_v19 }
0x20e8   :  { %v2224_v20 = vpop.permute.xlu0 %2223 }
0x20e9   :  { %v2226_v21 = vmul.f32 %v2224_v20, %v2217_v19 }
0x20eb   :  { %2228 = vrot.lane.b32.xlu1 %v2226_v21, %s4430_s4 }
0x215d   :  { %v2229_v24 = vpop.permute.xlu1 %2228 }
0x215e   :  { %v2231_v25 = vadd.f32 %v2229_v24, %v2221_v23 }
0x2160   :  { %4326 = vtanh.f32 %v2231_v25  ;;  %v2322_v41 = vrot.slane %v2231_v25, 6 }
0x216a   :  { %v4327_v26 = vpop.eup %4326 }
0x216b   :  { %2234 = vrot.lane.b32.xlu0 %v4327_v26, %s4429_s0 }
0x21dd   :  { %v2235_v27 = vpop.permute.xlu0 %2234 }
0x21de   :  { %v2237_v29 = vmul.f32 %v2235_v27, %v2217_v19 }
0x21e0   :  { %2239 = vrot.lane.b32.xlu1 %v2237_v29, %s4429_s0 }
0x2252   :  { %v2240_v37 = vpop.permute.xlu1 %2239 }
0x2253   :  { %3964 = vmatmul.mubr.msk.f32.vlgmr.msra.gmra.mrb[56].mxu0 %vm1414_vm11, %v2240_v37 }
0x2254   :  { %4186 = vmatpush3.bf16.msra.mxu0 %v4730_v28  ;;  %3985 = vmatprep.mubr.msk.f32.mxu0 %vm4425_vm0, %v4426_v1 }
0x2255   :  { %4187 = vmatprep.subr.bf16.mxu0 %v4424_v0 }
0x2258   :  { %4189 = vmatpush3.bf16.msra.mxu0 %v4733_v32 }
0x2259   :  { %4196 = vmatprep.subr.bf16.mxu0 %v4424_v0 }
0x2326   :  { %v2309_v30 = vpop.f32.mrb[56].mxu0 }
0x2327   :  { %v2314_v31 = vrot.slane %v2309_v30, 6  ;;  %v3965_v10 = vpop.f32.mrb[57].mxu0 }
0x2328   :  { %v4954_v10 = vadd.f32 %v4711_v2, %v4777_v47 }
0x2329   :  { %v2316_v33 = vadd.f32 %v2314_v31, %v4890_v13 }
0x232b   :  { %v2317_v34 = vmul.f32 %v2316_v33, %v4713_v5 }
0x232d   :  { %4328 = vtanh.f32 %v2317_v34 }
0x2337   :  { %v4329_v35 = vpop.eup %4328 }
0x2338   :  { %v2319_v39 = vmul.f32 %v4329_v35, %v4713_v5 }
0x233a   :  { %v2320_v36 = vadd.f32 %v2319_v39, %v4721_v11 }
0x233c   :  { %2326 = vrot.lane.b32.xlu0 %v2320_v36, %s4429_s0  ;;  %v2324_v6 = vmul.f32 %v2322_v41, %v2320_v36 }
0x23ae   :  { %v2327_v38 = vpop.permute.xlu0 %2326 }
0x23af   :  { %v2329_v40 = vmul.f32 %v2327_v38, %v2320_v36 }
0x23b1   :  { %2331 = vrot.lane.b32.xlu1 %v2329_v40, %s4430_s4 }
0x2423   :  { %v2332_v42 = vpop.permute.xlu1 %2331 }
0x2424   :  { %v2334_v44 = vadd.f32 %v2332_v42, %v2324_v6 }
0x2426   :  { %4330 = vtanh.f32 %v2334_v44  ;;  %v2426_v63 = vrot.slane %v2334_v44, 6 }
0x2430   :  { %v4331_v46 = vpop.eup %4330 }
0x2431   :  { %2337 = vrot.lane.b32.xlu0 %v4331_v46, %s4429_s0 }
0x24a3   :  { %v2338_v48 = vpop.permute.xlu0 %2337 }
0x24a4   :  { %v2340_v51 = vmul.f32 %v2338_v48, %v2320_v36 }
0x24a6   :  { %v2342_v52 = vrot.slane %v2340_v51, 2 }
0x24a8   :  { %2343 = vrot.lane.b32.xlu1 %v2342_v52, %s4429_s0 }
0x251a   :  { %v2344_v53 = vpop.permute.xlu1 %2343 }
0x251b   :  { %3975 = vmatmul.mubr.msk.f32.vlgmr.msra.gmra.mrb[60].mxu1 %vm1414_vm11, %v2344_v53 }
0x251c   :  { %4192 = vmatpush3.bf16.msra.mxu1 %v4730_v28  ;;  %3996 = vmatprep.mubr.msk.f32.mxu1 %vm4425_vm0, %v4426_v1 }
0x251d   :  { %4193 = vmatprep.subr.bf16.mxu1 %v4424_v0 }
0x2520   :  { %4195 = vmatpush3.bf16.msra.mxu1 %v4733_v32 }
0x2521   :  { %4202 = vmatprep.subr.bf16.mxu1 %v4424_v0 }
0x25ee   :  { %v2413_v54 = vpop.f32.mrb[60].mxu1 }
0x25ef   :  { %v2418_v55 = vrot.slane %v2413_v54, 4  ;;  %v3976_v56 = vpop.f32.mrb[61].mxu1 }
0x25f1   :  { %v2420_v57 = vadd.f32 %v2418_v55, %v4890_v13 }
0x25f3   :  { %v2421_v58 = vmul.f32 %v2420_v57, %v4713_v5 }
0x25f5   :  { %4332 = vtanh.f32 %v2421_v58 }
0x25ff   :  { %v4333_v59 = vpop.eup %4332 }
0x2600   :  { %v2423_v43 = vmul.f32 %v4333_v59, %v4713_v5 }
0x2602   :  { %v2424_v60 = vadd.f32 %v2423_v43, %v4721_v11 }
0x2604   :  { %2430 = vrot.lane.b32.xlu0 %v2424_v60, %s4429_s0  ;;  %v2428_v3 = vmul.f32 %v2426_v63, %v2424_v60 }
0x2676   :  { %v2431_v61 = vpop.permute.xlu0 %2430 }
0x2677   :  { %v2433_v62 = vmul.f32 %v2431_v61, %v2424_v60 }
0x2679   :  { %2435 = vrot.lane.b32.xlu1 %v2433_v62, %s4430_s4 }
0x26eb   :  { %v2436_v4 = vpop.permute.xlu1 %2435 }
0x26ec   :  { %v2438_v49 = vadd.f32 %v2436_v4, %v2428_v3 }
0x26ee   :  { %4334 = vtanh.f32 %v2438_v49  ;;  %v2530_v24 = vrot.slane %v2438_v49, 6 }
0x26f8   :  { %v4335_v7 = vpop.eup %4334 }
0x26f9   :  { %2441 = vrot.lane.b32.xlu0 %v4335_v7, %s4429_s0 }
0x276b   :  { %v2442_v8 = vpop.permute.xlu0 %2441 }
0x276c   :  { %v2444_v9 = vmul.f32 %v2442_v8, %v2424_v60 }
0x276e   :  { %v2446_v12 = vrot.slane %v2444_v9, 4 }
0x2770   :  { %2447 = vrot.lane.b32.xlu1 %v2446_v12, %s4429_s0 }
0x27e2   :  { %v2448_v14 = vpop.permute.xlu1 %2447 }
0x27e3   :  { %3986 = vmatmul.mubr.msk.f32.vlgmr.msra.gmra.mrb[58].mxu0 %vm1414_vm11, %v2448_v14 }
0x27e4   :  { %4198 = vmatpush3.bf16.msra.mxu0 %v4730_v28  ;;  %4007 = vmatprep.mubr.msk.f32.mxu0 %vm4425_vm0, %v4426_v1 }
0x27e5   :  { %4199 = vmatprep.subr.bf16.mxu0 %v4424_v0 }
0x27e8   :  { %4201 = vmatpush3.bf16.msra.mxu0 %v4733_v32 }
0x27e9   :  { %4208 = vmatprep.subr.bf16.mxu0 %v4424_v0 }
0x28b6   :  { %v2517_v15 = vpop.f32.mrb[58].mxu0 }
0x28b7   :  { %v2522_v22 = vrot.slane %v2517_v15, 2  ;;  %v3987_v16 = vpop.f32.mrb[59].mxu0 }
0x28b9   :  { %v2524_v17 = vadd.f32 %v2522_v22, %v4890_v13 }
0x28bb   :  { %v2525_v18 = vmul.f32 %v2524_v17, %v4713_v5 }
0x28bd   :  { %4336 = vtanh.f32 %v2525_v18 }
0x28c7   :  { %v4337_v19 = vpop.eup %4336 }
0x28c8   :  { %v2527_v20 = vmul.f32 %v4337_v19, %v4713_v5 }
0x28ca   :  { %v2528_v21 = vadd.f32 %v2527_v20, %v4721_v11 }
0x28cc   :  { %2534 = vrot.lane.b32.xlu0 %v2528_v21, %s4429_s0  ;;  %v2532_v25 = vmul.f32 %v2530_v24, %v2528_v21 }
0x293e   :  { %v2535_v45 = vpop.permute.xlu0 %2534 }
0x293f   :  { %v2537_v23 = vmul.f32 %v2535_v45, %v2528_v21 }
0x2941   :  { %2539 = vrot.lane.b32.xlu1 %v2537_v23, %s4430_s4 }
0x29b3   :  { %v2540_v26 = vpop.permute.xlu1 %2539 }
0x29b4   :  { %v2542_v27 = vadd.f32 %v2540_v26, %v2532_v25 }
0x29b6   :  { %4338 = vtanh.f32 %v2542_v27  ;;  %v2631_v2 = vrot.slane %v2542_v27, 6 }
0x29c0   :  { %v4339_v13 = vpop.eup %4338 }
0x29c1   :  { %2545 = vrot.lane.b32.xlu0 %v4339_v13, %s4429_s0 }
0x2a33   :  { %v2546_v29 = vpop.permute.xlu0 %2545 }
0x2a34   :  { %v2548_v37 = vmul.f32 %v2546_v29, %v2528_v21 }
0x2a36   :  { %v2550_v30 = vrot.slane %v2548_v37, 6 }
0x2a38   :  { %2551 = vrot.lane.b32.xlu1 %v2550_v30, %s4429_s0 }
0x2aaa   :  { %v2552_v31 = vpop.permute.xlu1 %2551 }
0x2aab   :  { %3997 = vmatmul.mubr.msk.f32.vlgmr.msra.gmra.mrb[62].mxu1 %vm1414_vm11, %v2552_v31 }
0x2aac   :  { %4204 = vmatpush3.bf16.msra.mxu1 %v4730_v28  ;;  %4018 = vmatprep.mubr.msk.f32.mxu1 %vm4425_vm0, %v4426_v1 }
0x2aad   :  { %4205 = vmatprep.subr.bf16.mxu1 %v4424_v0 }
0x2ab0   :  { %4207 = vmatpush3.bf16.msra.mxu1 %v4733_v32 }
0x2ab1   :  { %4214 = vmatprep.subr.bf16.mxu1 %v4424_v0 }
0x2b7e   :  { %v2621_v33 = vpop.f32.mrb[62].mxu1 }
0x2b7f   :  { %v2625_v34 = vadd.f32 %v2621_v33, %v4954_v10  ;;  %v3998_v35 = vpop.f32.mrb[63].mxu1 }
0x2b81   :  { %v2626_v39 = vmul.f32 %v2625_v34, %v4713_v5 }
0x2b83   :  { %4340 = vtanh.f32 %v2626_v39 }
0x2b8d   :  { %v4341_v36 = vpop.eup %4340 }
0x2b8e   :  { %v2628_v38 = vmul.f32 %v4341_v36, %v4713_v5 }
0x2b90   :  { %v2629_v40 = vadd.f32 %v2628_v38, %v4721_v11 }
0x2b92   :  { %2635 = vrot.lane.b32.xlu0 %v2629_v40, %s4429_s0  ;;  %v2633_v47 = vmul.f32 %v2631_v2, %v2629_v40 }
0x2c04   :  { %v2636_v41 = vpop.permute.xlu0 %2635 }
0x2c05   :  { %v2638_v6 = vmul.f32 %v2636_v41, %v2629_v40 }
0x2c07   :  { %2640 = vrot.lane.b32.xlu1 %v2638_v6, %s4430_s4 }
0x2c79   :  { %v2641_v42 = vpop.permute.xlu1 %2640 }
0x2c7a   :  { %v2643_v44 = vadd.f32 %v2641_v42, %v2633_v47 }
0x2c7c   :  { %4342 = vtanh.f32 %v2643_v44  ;;  %v2734_v62 = vrot.slane %v2643_v44, 6 }
0x2c86   :  { %v4343_v46 = vpop.eup %4342 }
0x2c87   :  { %2646 = vrot.lane.b32.xlu0 %v4343_v46, %s4429_s0 }
0x2cf9   :  { %v2647_v48 = vpop.permute.xlu0 %2646 }
0x2cfa   :  { %v2649_v51 = vmul.f32 %v2647_v48, %v2629_v40 }
0x2cfc   :  { %2651 = vrot.lane.b32.xlu1 %v2649_v51, %s4429_s0 }
0x2d6e   :  { %v2652_v52 = vpop.permute.xlu1 %2651 }
0x2d6f   :  { %4008 = vmatmul.mubr.msk.f32.vlgmr.msra.gmra.mrb[60].mxu0 %vm1414_vm11, %v2652_v52 }
0x2d70   :  { %4210 = vmatpush3.bf16.msra.mxu0 %v4730_v28  ;;  %4029 = vmatprep.mubr.msk.f32.mxu0 %vm4425_vm0, %v4426_v1 }
0x2d71   :  { %4211 = vmatprep.subr.bf16.mxu0 %v4424_v0 }
0x2d74   :  { %4213 = vmatpush3.bf16.msra.mxu0 %v4733_v32 }
0x2d75   :  { %4220 = vmatprep.subr.bf16.mxu0 %v4424_v0 }
0x2e42   :  { %v2721_v53 = vpop.f32.mrb[60].mxu0 }
0x2e43   :  { %v2726_v54 = vrot.slane %v2721_v53, 6  ;;  %v4009_v55 = vpop.f32.mrb[61].mxu0  ;;  %v4372_v53 = vld [vmem:[#allocation2 + $0x99] ss:$0 sm:$0xff] }
0x2e45   :  { %v2728_v56 = vadd.f32 %v2726_v54, %v4954_v10  ;;  %v5016_v54 = vadd.f32 %v4372_v53, %v4779_v50 }
0x2e47   :  { %v2729_v57 = vmul.f32 %v2728_v56, %v4713_v5 }
0x2e49   :  { %4344 = vtanh.f32 %v2729_v57 }
0x2e53   :  { %v4345_v58 = vpop.eup %4344 }
0x2e54   :  { %v2731_v59 = vmul.f32 %v4345_v58, %v4713_v5 }
0x2e56   :  { %v2732_v43 = vadd.f32 %v2731_v59, %v4721_v11 }
0x2e58   :  { %2738 = vrot.lane.b32.xlu0 %v2732_v43, %s4429_s0  ;;  %v2736_v63 = vmul.f32 %v2734_v62, %v2732_v43 }
0x2eca   :  { %v2739_v60 = vpop.permute.xlu0 %2738 }
0x2ecb   :  { %v2741_v61 = vmul.f32 %v2739_v60, %v2732_v43 }
0x2ecd   :  { %2743 = vrot.lane.b32.xlu1 %v2741_v61, %s4430_s4 }
0x2f3f   :  { %v2744_v3 = vpop.permute.xlu1 %2743 }
0x2f40   :  { %v2746_v4 = vadd.f32 %v2744_v3, %v2736_v63 }
0x2f42   :  { %4346 = vtanh.f32 %v2746_v4  ;;  %v2838_v23 = vrot.slane %v2746_v4, 6 }
0x2f4c   :  { %v4347_v49 = vpop.eup %4346 }
0x2f4d   :  { %2749 = vrot.lane.b32.xlu0 %v4347_v49, %s4429_s0 }
0x2fbf   :  { %v2750_v7 = vpop.permute.xlu0 %2749 }
0x2fc0   :  { %v2752_v8 = vmul.f32 %v2750_v7, %v2732_v43 }
0x2fc2   :  { %v2754_v9 = vrot.slane %v2752_v8, 2 }
0x2fc4   :  { %2755 = vrot.lane.b32.xlu1 %v2754_v9, %s4429_s0 }
0x3036   :  { %v2756_v12 = vpop.permute.xlu1 %2755 }
0x3037   :  { %4019 = vmatmul.mubr.msk.f32.vlgmr.msra.gmra.mrb[64].mxu1 %vm1414_vm11, %v2756_v12 }
0x3038   :  { %4216 = vmatpush3.bf16.msra.mxu1 %v4730_v28  ;;  %4040 = vmatprep.mubr.msk.f32.mxu1 %vm4425_vm0, %v4426_v1 }
0x3039   :  { %4217 = vmatprep.subr.bf16.mxu1 %v4424_v0 }
0x303c   :  { %4219 = vmatpush3.bf16.msra.mxu1 %v4733_v32 }
0x303d   :  { %4226 = vmatprep.subr.bf16.mxu1 %v4424_v0 }
0x310a   :  { %v2825_v14 = vpop.f32.mrb[64].mxu1 }
0x310b   :  { %v2830_v15 = vrot.slane %v2825_v14, 4  ;;  %v4020_v22 = vpop.f32.mrb[65].mxu1 }
0x310d   :  { %v2832_v16 = vadd.f32 %v2830_v15, %v4954_v10 }
0x310f   :  { %v2833_v17 = vmul.f32 %v2832_v16, %v4713_v5 }
0x3111   :  { %4348 = vtanh.f32 %v2833_v17 }
0x311b   :  { %v4349_v18 = vpop.eup %4348 }
0x311c   :  { %v2835_v19 = vmul.f32 %v4349_v18, %v4713_v5 }
0x311e   :  { %v2836_v20 = vadd.f32 %v2835_v19, %v4721_v11 }
0x3120   :  { %2842 = vrot.lane.b32.xlu0 %v2836_v20, %s4429_s0  ;;  %v2840_v24 = vmul.f32 %v2838_v23, %v2836_v20 }
0x3192   :  { %v2843_v21 = vpop.permute.xlu0 %2842 }
0x3193   :  { %v2845_v45 = vmul.f32 %v2843_v21, %v2836_v20 }
0x3195   :  { %2847 = vrot.lane.b32.xlu1 %v2845_v45, %s4430_s4 }
0x3207   :  { %v2848_v25 = vpop.permute.xlu1 %2847 }
0x3208   :  { %v2850_v26 = vadd.f32 %v2848_v25, %v2840_v24 }
0x320a   :  { %4350 = vtanh.f32 %v2850_v26  ;;  %v2942_v2 = vrot.slane %v2850_v26, 6 }
0x3214   :  { %v4351_v27 = vpop.eup %4350 }
0x3215   :  { %2853 = vrot.lane.b32.xlu0 %v4351_v27, %s4429_s0 }
0x3287   :  { %v2854_v13 = vpop.permute.xlu0 %2853 }
0x3288   :  { %v2856_v29 = vmul.f32 %v2854_v13, %v2836_v20 }
0x328a   :  { %v2858_v37 = vrot.slane %v2856_v29, 4 }
0x328c   :  { %2859 = vrot.lane.b32.xlu1 %v2858_v37, %s4429_s0 }
0x32fe   :  { %v2860_v30 = vpop.permute.xlu1 %2859 }
0x32ff   :  { %4030 = vmatmul.mubr.msk.f32.vlgmr.msra.gmra.mrb[62].mxu0 %vm1414_vm11, %v2860_v30 }
0x3300   :  { %4222 = vmatpush3.bf16.msra.mxu0 %v4730_v28  ;;  %4051 = vmatprep.mubr.msk.f32.mxu0 %vm4425_vm0, %v4426_v1 }
0x3301   :  { %4223 = vmatprep.subr.bf16.mxu0 %v4424_v0 }
0x3304   :  { %4225 = vmatpush3.bf16.msra.mxu0 %v4733_v32 }
0x3305   :  { %4232 = vmatprep.subr.bf16.mxu0 %v4424_v0 }
0x33d2   :  { %v2929_v31 = vpop.f32.mrb[62].mxu0 }
0x33d3   :  { %v2934_v33 = vrot.slane %v2929_v31, 2  ;;  %v4031_v34 = vpop.f32.mrb[63].mxu0 }
0x33d5   :  { %v2936_v35 = vadd.f32 %v2934_v33, %v4954_v10 }
0x33d7   :  { %v2937_v39 = vmul.f32 %v2936_v35, %v4713_v5 }
0x33d9   :  { %4352 = vtanh.f32 %v2937_v39 }
0x33e3   :  { %v4353_v36 = vpop.eup %4352 }
0x33e4   :  { %v2939_v38 = vmul.f32 %v4353_v36, %v4713_v5 }
0x33e6   :  { %v2940_v40 = vadd.f32 %v2939_v38, %v4721_v11 }
0x33e8   :  { %2946 = vrot.lane.b32.xlu0 %v2940_v40, %s4429_s0  ;;  %v2944_v47 = vmul.f32 %v2942_v2, %v2940_v40 }
0x345a   :  { %v2947_v41 = vpop.permute.xlu0 %2946 }
0x345b   :  { %v2949_v6 = vmul.f32 %v2947_v41, %v2940_v40 }
0x345d   :  { %2951 = vrot.lane.b32.xlu1 %v2949_v6, %s4430_s4 }
0x34cf   :  { %v2952_v42 = vpop.permute.xlu1 %2951 }
0x34d0   :  { %v2954_v44 = vadd.f32 %v2952_v42, %v2944_v47 }
0x34d2   :  { %4354 = vtanh.f32 %v2954_v44  ;;  %v3043_v50 = vrot.slane %v2954_v44, 6 }
0x34dc   :  { %v4355_v10 = vpop.eup %4354 }
0x34dd   :  { %2957 = vrot.lane.b32.xlu0 %v4355_v10, %s4429_s0 }
0x354f   :  { %v2958_v46 = vpop.permute.xlu0 %2957 }
0x3550   :  { %v2960_v48 = vmul.f32 %v2958_v46, %v2940_v40 }
0x3552   :  { %v2962_v51 = vrot.slane %v2960_v48, 6 }
0x3554   :  { %2963 = vrot.lane.b32.xlu1 %v2962_v51, %s4429_s0 }
0x35c6   :  { %v2964_v52 = vpop.permute.xlu1 %2963 }
0x35c7   :  { %4041 = vmatmul.mubr.msk.f32.vlgmr.msra.gmra.mrb[66].mxu1 %vm1414_vm11, %v2964_v52 }
0x35c8   :  { %4228 = vmatpush3.bf16.msra.mxu1 %v4730_v28  ;;  %4062 = vmatprep.mubr.msk.f32.mxu1 %vm4425_vm0, %v4426_v1 }
0x35c9   :  { %4229 = vmatprep.subr.bf16.mxu1 %v4424_v0 }
0x35cc   :  { %4231 = vmatpush3.bf16.msra.mxu1 %v4733_v32 }
0x369a   :  { %v3033_v55 = vpop.f32.mrb[66].mxu1 }
0x369b   :  { %v3037_v56 = vadd.f32 %v3033_v55, %v5016_v54  ;;  %v4042_v57 = vpop.f32.mrb[67].mxu1 }
0x369d   :  { %v3038_v58 = vmul.f32 %v3037_v56, %v4713_v5 }
0x369f   :  { %4356 = vtanh.f32 %v3038_v58 }
0x36a9   :  { %v4357_v59 = vpop.eup %4356 }
0x36aa   :  { %v3040_v43 = vmul.f32 %v4357_v59, %v4713_v5 }
0x36ac   :  { %v3041_v60 = vadd.f32 %v3040_v43, %v4721_v11 }
0x36ae   :  { %3047 = vrot.lane.b32.xlu0 %v3041_v60, %s4429_s0  ;;  %v3045_v63 = vmul.f32 %v3043_v50, %v3041_v60 }
0x3720   :  { %v3048_v61 = vpop.permute.xlu0 %3047 }
0x3721   :  { %v3050_v62 = vmul.f32 %v3048_v61, %v3041_v60 }
0x3723   :  { %3052 = vrot.lane.b32.xlu1 %v3050_v62, %s4430_s4 }
0x3795   :  { %v3053_v3 = vpop.permute.xlu1 %3052 }
0x3796   :  { %v3055_v4 = vadd.f32 %v3053_v3, %v3045_v63 }
0x3798   :  { %4358 = vtanh.f32 %v3055_v4 }
0x37a2   :  { %v4359_v49 = vpop.eup %4358 }
0x37a3   :  { %3058 = vrot.lane.b32.xlu0 %v4359_v49, %s4429_s0 }
0x3815   :  { %v3059_v7 = vpop.permute.xlu0 %3058 }
0x3816   :  { %v3061_v8 = vmul.f32 %v3059_v7, %v3041_v60 }
0x3818   :  { %3063 = vrot.lane.b32.xlu1 %v3061_v8, %s4429_s0 }
0x388a   :  { %v3064_v9 = vpop.permute.xlu1 %3063 }
0x388b   :  { %4052 = vmatmul.mubr.msk.f32.vlgmr.msra.gmra.mrb[64].mxu0 %vm1414_vm11, %v3064_v9 }
0x388c   :  { %4234 = vmatpush3.bf16.msra.mxu0 %v4730_v28  ;;  %4073 = vmatprep.mubr.msk.f32.mxu0 %vm4425_vm0, %v4426_v1 }
0x388d   :  { %4235 = vmatprep.subr.bf16.mxu0 %v4424_v0  ;;  %v3146_v0 = vrot.slane %v3055_v4, 6 }
0x3890   :  { %4237 = vmatpush3.bf16.msra.mxu0 %v4733_v32 }
0x395e   :  { %v3133_v12 = vpop.f32.mrb[64].mxu0 }
0x395f   :  { %v3138_v14 = vrot.slane %v3133_v12, 6  ;;  %v4053_v15 = vpop.f32.mrb[65].mxu0 }
0x3961   :  { %v3140_v22 = vadd.f32 %v3138_v14, %v5016_v54 }
0x3963   :  { %v3141_v16 = vmul.f32 %v3140_v22, %v4713_v5 }
0x3965   :  { %4360 = vtanh.f32 %v3141_v16 }
0x396f   :  { %v4361_v17 = vpop.eup %4360 }
0x3970   :  { %v3143_v18 = vmul.f32 %v4361_v17, %v4713_v5 }
0x3972   :  { %v3144_v28 = vadd.f32 %v3143_v18, %v4721_v11 }
0x3974   :  { %3150 = vrot.lane.b32.xlu0 %v3144_v28, %s4429_s0  ;;  %v3148_v32 = vmul.f32 %v3146_v0, %v3144_v28 }
0x39e6   :  { %v3151_v1 = vpop.permute.xlu0 %3150 }
0x39e7   :  { %v3153_v19 = vmul.f32 %v3151_v1, %v3144_v28 }
0x39e9   :  { %3155 = vrot.lane.b32.xlu1 %v3153_v19, %s4430_s4 }
0x3a5b   :  { %v3156_v20 = vpop.permute.xlu1 %3155 }
0x3a5c   :  { %v3158_v21 = vadd.f32 %v3156_v20, %v3148_v32 }
0x3a5e   :  { %4362 = vtanh.f32 %v3158_v21  ;;  %v3250_v36 = vrot.slane %v3158_v21, 6 }
0x3a68   :  { %v4363_v45 = vpop.eup %4362 }
0x3a69   :  { %3161 = vrot.lane.b32.xlu0 %v4363_v45, %s4429_s0 }
0x3adb   :  { %v3162_v23 = vpop.permute.xlu0 %3161 }
0x3adc   :  { %v3164_v24 = vmul.f32 %v3162_v23, %v3144_v28 }
0x3ade   :  { %v3166_v25 = vrot.slane %v3164_v24, 2 }
0x3ae0   :  { %3167 = vrot.lane.b32.xlu1 %v3166_v25, %s4429_s0 }
0x3b52   :  { %v3168_v26 = vpop.permute.xlu1 %3167 }
0x3b53   :  { %4063 = vmatmul.mubr.msk.f32.vlgmr.msra.gmra.mrb[68].mxu1 %vm1414_vm11, %v3168_v26 }
0x3c26   :  { %v3237_v27 = vpop.f32.mrb[68].mxu1 }
0x3c27   :  { %v3242_v13 = vrot.slane %v3237_v27, 4  ;;  %v4064_v29 = vpop.f32.mrb[69].mxu1 }
0x3c29   :  { %v3244_v37 = vadd.f32 %v3242_v13, %v5016_v54 }
0x3c2b   :  { %v3245_v30 = vmul.f32 %v3244_v37, %v4713_v5 }
0x3c2d   :  { %4364 = vtanh.f32 %v3245_v30 }
0x3c37   :  { %v4365_v31 = vpop.eup %4364 }
0x3c38   :  { %v3247_v33 = vmul.f32 %v4365_v31, %v4713_v5 }
0x3c3a   :  { %v3248_v34 = vadd.f32 %v3247_v33, %v4721_v11 }
0x3c3c   :  { %3254 = vrot.lane.b32.xlu0 %v3248_v34, %s4429_s0  ;;  %v3252_v38 = vmul.f32 %v3250_v36, %v3248_v34 }
0x3cae   :  { %v3255_v35 = vpop.permute.xlu0 %3254 }
0x3caf   :  { %v3257_v39 = vmul.f32 %v3255_v35, %v3248_v34 }
0x3cb1   :  { %3259 = vrot.lane.b32.xlu1 %v3257_v39, %s4430_s4 }
0x3d23   :  { %v3260_v40 = vpop.permute.xlu1 %3259 }
0x3d24   :  { %v3262_v41 = vadd.f32 %v3260_v40, %v3252_v38 }
0x3d26   :  { %4366 = vtanh.f32 %v3262_v41  ;;  %v3354_v59 = vrot.slane %v3262_v41, 6 }
0x3d30   :  { %v4367_v6 = vpop.eup %4366 }
0x3d31   :  { %3265 = vrot.lane.b32.xlu0 %v4367_v6, %s4429_s0 }
0x3da3   :  { %v3266_v2 = vpop.permute.xlu0 %3265 }
0x3da4   :  { %v3268_v47 = vmul.f32 %v3266_v2, %v3248_v34 }
0x3da6   :  { %v3270_v42 = vrot.slane %v3268_v47, 4 }
0x3da8   :  { %3271 = vrot.lane.b32.xlu1 %v3270_v42, %s4429_s0 }
0x3e1a   :  { %v3272_v44 = vpop.permute.xlu1 %3271 }
0x3e1b   :  { %4074 = vmatmul.mubr.msk.f32.vlgmr.msra.gmra.mrb[66].mxu0 %vm1414_vm11, %v3272_v44 }
0x3eee   :  { %v3341_v10 = vpop.f32.mrb[66].mxu0 }
0x3eef   :  { %v3346_v46 = vrot.slane %v3341_v10, 2  ;;  %v4075_v48 = vpop.f32.mrb[67].mxu0 }
0x3ef1   :  { %v3348_v51 = vadd.f32 %v3346_v46, %v5016_v54 }
0x3ef3   :  { %v3349_v52 = vmul.f32 %v3348_v51, %v4713_v5 }
0x3ef5   :  { %4368 = vtanh.f32 %v3349_v52 }
0x3eff   :  { %v4369_v53 = vpop.eup %4368 }
0x3f00   :  { %v3351_v55 = vmul.f32 %v4369_v53, %v4713_v5 }
0x3f02   :  { %v3352_v56 = vadd.f32 %v3351_v55, %v4721_v11 }
0x3f04   :  { %3358 = vrot.lane.b32.xlu0 %v3352_v56, %s4429_s0  ;;  %v3356_v43 = vmul.f32 %v3354_v59, %v3352_v56 }
0x3f76   :  { %v3359_v57 = vpop.permute.xlu0 %3358 }
0x3f77   :  { %v3361_v58 = vmul.f32 %v3359_v57, %v3352_v56 }
0x3f79   :  { %3363 = vrot.lane.b32.xlu1 %v3361_v58, %s4430_s4 }
0x3feb   :  { %v3364_v60 = vpop.permute.xlu1 %3363 }
0x3fec   :  { %v3366_v61 = vadd.f32 %v3364_v60, %v3356_v43 }
0x3fee   :  { %4370 = vtanh.f32 %v3366_v61 }
0x3ff8   :  { %v4371_v54 = vpop.eup %4370 }
0x3ff9   :  { %3369 = vrot.lane.b32.xlu0 %v4371_v54, %s4429_s0 }
0x406b   :  { %v3370_v62 = vpop.permute.xlu0 %3369 }
0x406c   :  { %v3372_v50 = vmul.f32 %v3370_v62, %v3352_v56 }
0x406e   :  { %3374 = vrot.lane.b32.xlu1 %v3372_v50, %s4429_s0 }
0x40e0   :  { %v3375_v5 = vpop.permute.xlu1 %3374 }
0x40e1   :  { %3378 = vst.msk [vmem:[#allocation5 - $0x6] sm:$0xc0] %vm3377_vm12, %v3375_v5 }
0x40e2   :  { %4406 = shalt.err (!%p4403_p12)
}
0x40e3   :  { %s4407_s11 = scalar_lea.hbm %s5072_s2, 32 }
0x40e4   :  { %p4408_p13 = scmp.ne.s32.totalorder %s5072_s2, %s4407_s11  ;;  %p4411_p0 = scmp.lt.u32.totalorder %s4407_s11, %s5072_s2 }
0x40e6   :  { %p4413_p1 = pnand %p4411_p0, %p4408_p13 }
0x40e8   :  { %4416 = shalt.err (!%p4413_p1)
}
0x40e9   :  { %3388 = dma.vmem_to_hbm [thread:$0]  %s3386_s7, 32, %s5072_s2, [#allocation4]  }
0x40ea   :  { %4419 = dma.done.wait [#allocation4], 32  }
0x40eb   :  { %4420 = vsyncadd [#allocation4], 4294967264 }
0x40ec   :  { %3392 = vsyncpa [#allocation3], 1 }
0x40ed   :  { %3393 = vsyncpa [#allocation4], 1 }

</bundles_post_ra>
